<compile_context>
chip_gen: v5e
topology: v5e:2x2
jax: 0.10.0
libtpu: 0.0.40
codegen_flags: <defaults>
</compile_context>

<pallas_src>
import jax
import jax.numpy as jnp
from jax.experimental import pallas as pl
from jax.experimental.pallas import tpu as pltpu


# ---------------------------------------------------------------------------
# Fused two-layer GCN kernel.
#   layer 0 (l==0):  acc += A[i,k] @ (X@W1)[k] ; finalize -> z1 = relu(acc+b1)+pert
#                    hw2[i-rows] = (z1 @ W2)            (stays in VMEM, bf16)
#   layer 1 (l==1):  acc += A[i,k] @ hw2[k]     ; finalize -> z2 = relu(acc+b2)
#                    z2 written out ; g += P[:, i-rows] @ z2  (resident accumulator)
# ---------------------------------------------------------------------------
def _fused_gcn_kernel(a_ref, hw1_ref, w2_ref, b1_ref, b2_ref, pert_ref, p_ref,
                      z2_ref, g_ref, hw2_ref, acc_ref):
    l = pl.program_id(0)
    i = pl.program_id(1)
    k = pl.program_id(2)
    n_k = pl.num_programs(2)
    tm, tk = a_ref.shape

    # Zero the per-(layer, row-tile) accumulator at the start of each reduction.
    @pl.when(k == 0)
    def _init_acc():
        acc_ref[...] = jnp.zeros_like(acc_ref)

    # Zero the resident pooled-output accumulator once, at the very first grid step.
    @pl.when((l == 0) & (i == 0) & (k == 0))
    def _init_g():
        g_ref[...] = jnp.zeros_like(g_ref)

    # ---- contraction step -------------------------------------------------
    @pl.when(l == 0)
    def _layer1_step():
        acc_ref[...] += jnp.dot(a_ref[...], hw1_ref[...],
                                preferred_element_type=jnp.float32)

    @pl.when(l == 1)
    def _layer2_step():
        k0 = pl.multiple_of(k * tk, tk)
        acc_ref[...] += jnp.dot(a_ref[...], hw2_ref[pl.ds(k0, tk), :],
                                preferred_element_type=jnp.float32)

    # ---- layer-1 finalize: project z1 with W2 and keep it in VMEM ----------
    @pl.when((l == 0) & (k == n_k - 1))
    def _layer1_finalize():
        z1 = jnp.maximum(acc_ref[...] + b1_ref[...], 0.0) + pert_ref[...]
        i0 = pl.multiple_of(i * tm, tm)
        hw2_ref[pl.ds(i0, tm), :] = jnp.dot(
            z1.astype(jnp.bfloat16), w2_ref[...],
            preferred_element_type=jnp.float32).astype(jnp.bfloat16)
        # Keep the (revisited) z2 output block defined; overwritten by the l==1 pass.
        z2_ref[...] = z1

    # ---- layer-2 finalize: write z2 and accumulate global-add-pool ---------
    @pl.when((l == 1) & (k == n_k - 1))
    def _layer2_finalize():
        z2 = jnp.maximum(acc_ref[...] + b2_ref[...], 0.0)
        z2_ref[...] = z2
        g_ref[...] += jnp.dot(p_ref[...], z2, preferred_element_type=jnp.float32)


def _round_up(x, m):
    return (x + m - 1) // m * m


def _fused_gcn_encoder(params, x, a_hat, pool, perturb_first=None):
    """Run the fused 2-layer GCN + add-pool.  Returns (z2 [N,H], g2 [G,H]) unperturbed."""
    n = x.shape[0]
    hidden = params["w1"].shape[1]
    g = pool.shape[0]

    h_pad = _round_up(hidden, 128)        # lane-dense hidden axis
    n_pad = _round_up(n, 128)
    g_pad = _round_up(g, 8)

    # 256-granular tiles when N allows (feeds the 256x256 MXU on v6e/v7x), else 128.
    tm = 256 if n_pad % 256 == 0 else 128
    tk = 256 if n_pad % 256 == 0 else 128
    tm, tk = min(tm, n_pad), min(tk, n_pad)

    bf16 = jnp.bfloat16
    # Padded / cast operands.  Zero padding is exact (padded A rows/cols are zero,
    # padded hidden columns of W/b are zero, padded P columns are zero).
    a_p = jnp.zeros((n_pad, n_pad), bf16).at[:n, :n].set(a_hat.astype(bf16))
    xw1 = jnp.dot(x, params["w1"], preferred_element_type=jnp.float32)       # tiny
    hw1_p = jnp.zeros((n_pad, h_pad), bf16).at[:n, :hidden].set(xw1.astype(bf16))
    w2_p = jnp.zeros((h_pad, h_pad), bf16).at[:hidden, :hidden].set(
        params["w2"].astype(bf16))
    b1_p = jnp.zeros((1, h_pad), jnp.float32).at[:, :hidden].set(params["b1"])
    b2_p = jnp.zeros((1, h_pad), jnp.float32).at[:, :hidden].set(params["b2"])
    pert_p = jnp.zeros((n_pad, h_pad), jnp.float32)
    if perturb_first is not None:
        pert_p = pert_p.at[:n, :hidden].set(perturb_first)
    pool_p = jnp.zeros((g_pad, n_pad), jnp.float32).at[:g, :n].set(pool)

    grid = (2, n_pad // tm, n_pad // tk)

    z2_p, g_p = pl.pallas_call(
        _fused_gcn_kernel,
        out_shape=(
            jax.ShapeDtypeStruct((n_pad, h_pad), jnp.float32),
            jax.ShapeDtypeStruct((g_pad, h_pad), jnp.float32),
        ),
        grid_spec=pltpu.PrefetchScalarGridSpec(
            num_scalar_prefetch=0,
            grid=grid,
            in_specs=[
                pl.BlockSpec((tm, tk), lambda l, i, k: (i, k)),        # A_hat (bf16)
                pl.BlockSpec((tk, h_pad), lambda l, i, k: (k, 0)),     # X @ W1 (bf16)
                pl.BlockSpec((h_pad, h_pad), lambda l, i, k: (0, 0)),  # W2 (bf16, resident)
                pl.BlockSpec((1, h_pad), lambda l, i, k: (0, 0)),      # b1 (resident)
                pl.BlockSpec((1, h_pad), lambda l, i, k: (0, 0)),      # b2 (resident)
                pl.BlockSpec((tm, h_pad), lambda l, i, k: (i, 0)),     # perturb_first
                pl.BlockSpec((g_pad, tm), lambda l, i, k: (0, i)),     # pooling slice
            ],
            out_specs=(
                pl.BlockSpec((tm, h_pad), lambda l, i, k: (i, 0)),     # z2
                pl.BlockSpec((g_pad, h_pad), lambda l, i, k: (0, 0)),  # g2 (resident acc)
            ),
            scratch_shapes=[
                pltpu.VMEM((n_pad, h_pad), bf16),       # hw2 = (z1 + pert) @ W2, VMEM-only
                pltpu.VMEM((tm, h_pad), jnp.float32),   # f32 row-tile accumulator
            ],
        ),
        compiler_params=pltpu.CompilerParams(
            # Layer axis + in-VMEM z1 hand-off serialize the grid -> all arbitrary.
            dimension_semantics=("arbitrary", "arbitrary", "arbitrary"),
            # Explicit scoped-VMEM budget: above 16/32 MiB defaults, below v7x's 64 MiB.
            vmem_limit_bytes=48 * 1024 * 1024,
        ),
    )(a_p, hw1_p, w2_p, b1_p, b2_p, pert_p, pool_p)

    return z2_p[:n, :hidden], g_p[:g, :hidden]


# ---------------------------------------------------------------------------
# Glue (plain JAX): normalized adjacency and pooling matrix from edge_index/batch.
# ---------------------------------------------------------------------------
def build_norm_adj(edge_index, num_nodes):
    """Dense D^{-1/2}(A+I)D^{-1/2}. Rows = targets, cols = sources (PyG convention);
    duplicate edges accumulate (matches GCNConv message summation)."""
    src, dst = edge_index[0], edge_index[1]
    a = jnp.zeros((num_nodes, num_nodes), jnp.float32)
    a = a.at[dst, src].add(1.0)
    a = a + jnp.eye(num_nodes, dtype=jnp.float32)           # self loops
    deg = jnp.sum(a, axis=1)
    dinv = jnp.where(deg > 0, jax.lax.rsqrt(deg), 0.0)
    return a * dinv[:, None] * dinv[None, :]


def build_pool(batch, num_graphs):
    """One-hot pooling matrix P [G, N]; P @ Z == global_add_pool(Z, batch)."""
    return jax.nn.one_hot(batch, num_graphs, dtype=jnp.float32).T


def gcn_encoder_forward(params, x, edge_index, num_graphs, batch=None,
                        perturb_first=None, perturb_last=None):
    """num_graphs must be a static Python int (no device sync / jit-safe)."""
    n = x.shape[0]
    if batch is None:
        batch = jnp.zeros((n,), jnp.int32)
    a_hat = build_norm_adj(edge_index, n)
    pool = build_pool(batch, num_graphs)
    z2, g2 = _fused_gcn_encoder(params, x, a_hat, pool, perturb_first)
    if perturb_last is not None:               # g2 is pooled from the unperturbed z2
        z2 = z2 + perturb_last
    return z2, g2


# ---------------------------------------------------------------------------
# Deterministic parameter init (glorot-uniform style).
# ---------------------------------------------------------------------------
def init_params(key, f_in, hidden):
    k1, k2 = jax.random.split(key)
    lim1 = (6.0 / (f_in + hidden)) ** 0.5
    lim2 = (6.0 / (hidden + hidden)) ** 0.5
    return {
        "w1": jax.random.uniform(k1, (f_in, hidden), jnp.float32, -lim1, lim1),
        "b1": jnp.zeros((1, hidden), jnp.float32),
        "w2": jax.random.uniform(k2, (hidden, hidden), jnp.float32, -lim2, lim2),
        "b2": jnp.zeros((1, hidden), jnp.float32),
    }


if __name__ == "__main__":
    key = jax.random.PRNGKey(0)
    kx, kp, kpf, kpl = jax.random.split(key, 4)

    # Small but multi-tile: 4 ring graphs of 72 nodes -> N=288, padded to 384 -> 3x3 tiles.
    NUM_GRAPHS, NODES_PER_GRAPH = 4, 72
    N = NUM_GRAPHS * NODES_PER_GRAPH
    F_IN, HIDDEN = 8, 32

    x = jax.random.normal(kx, (N, F_IN), jnp.float32)

    src, dst = [], []
    for gidx in range(NUM_GRAPHS):
        base = gidx * NODES_PER_GRAPH
        for i in range(NODES_PER_GRAPH):
            a, b = base + i, base + (i + 1) % NODES_PER_GRAPH
            src += [a, b]
            dst += [b, a]
    edge_index = jnp.array([src, dst], jnp.int32)
    batch = jnp.repeat(jnp.arange(NUM_GRAPHS, dtype=jnp.int32), NODES_PER_GRAPH)

    params = init_params(kp, F_IN, HIDDEN)
    perturb_first = 0.01 * jax.random.normal(kpf, (N, HIDDEN), jnp.float32)
    perturb_last = 0.01 * jax.random.normal(kpl, (N, HIDDEN), jnp.float32)

    z2, g2 = gcn_encoder_forward(params, x, edge_index, NUM_GRAPHS, batch,
                                 perturb_first=perturb_first,
                                 perturb_last=perturb_last)
    jax.block_until_ready((z2, g2))

    # Pure f32 JAX reference (kernel runs bf16 MXU inputs / f32 accumulation).
    a_hat = build_norm_adj(edge_index, N)
    pool = build_pool(batch, NUM_GRAPHS)
    z1_ref = jnp.maximum(a_hat @ (x @ params["w1"]) + params["b1"], 0.0) + perturb_first
    z2_pre = jnp.maximum(a_hat @ (z1_ref @ params["w2"]) + params["b2"], 0.0)
    g2_ref = pool @ z2_pre
    z2_ref = z2_pre + perturb_last

    def rel_err(a, b):
        return float(jnp.linalg.norm(a - b) / (jnp.linalg.norm(b) + 1e-12))

    assert z2.shape == (N, HIDDEN) and g2.shape == (NUM_GRAPHS, HIDDEN)
    ez, eg = rel_err(z2, z2_ref), rel_err(g2, g2_ref)
    assert ez < 3e-2, f"z2 relative error too large: {ez}"
    assert eg < 3e-2, f"g2 relative error too large: {eg}"

    print("KERNEL_OK")
</pallas_src>

<mosaic_0001>
module attributes {stable_mosaic.version = 11 : i64} {
  func.func @_fused_gcn_kernel(%arg0: i32, %arg1: i32, %arg2: i32, %arg3: memref<128x128xbf16, #tpu.memory_space<vmem>>, %arg4: memref<128x128xbf16, #tpu.memory_space<vmem>>, %arg5: memref<128x128xbf16, #tpu.memory_space<vmem>>, %arg6: memref<1x128xf32, #tpu.memory_space<vmem>>, %arg7: memref<1x128xf32, #tpu.memory_space<vmem>>, %arg8: memref<128x128xf32, #tpu.memory_space<vmem>>, %arg9: memref<8x128xf32, #tpu.memory_space<vmem>>, %arg10: memref<128x128xf32, #tpu.memory_space<vmem>>, %arg11: memref<8x128xf32, #tpu.memory_space<vmem>>, %arg12: memref<384x128xbf16, #tpu.memory_space<vmem>>, %arg13: memref<128x128xf32, #tpu.memory_space<vmem>>) attributes {dimension_semantics = [#tpu.dimension_semantics<arbitrary>, #tpu.dimension_semantics<arbitrary>, #tpu.dimension_semantics<arbitrary>], iteration_bounds = array<i64: 2, 3, 3>, scalar_prefetch = 0 : i64, scratch_operands = 2 : i64, tpu.core_type = #tpu.core_type<tc>, window_params = [{transform_indices = @transform_0, window_bounds = array<i64: 128, 128>}, {transform_indices = @transform_1, window_bounds = array<i64: 128, 128>}, {pipeline_mode = #tpu.pipeline_mode<synchronous>, transform_indices = @transform_2, window_bounds = array<i64: 128, 128>}, {pipeline_mode = #tpu.pipeline_mode<synchronous>, transform_indices = @transform_3, window_bounds = array<i64: 1, 128>}, {pipeline_mode = #tpu.pipeline_mode<synchronous>, transform_indices = @transform_4, window_bounds = array<i64: 1, 128>}, {transform_indices = @transform_5, window_bounds = array<i64: 128, 128>}, {transform_indices = @transform_6, window_bounds = array<i64: 8, 128>}, {transform_indices = @transform_7, window_bounds = array<i64: 128, 128>}, {pipeline_mode = #tpu.pipeline_mode<synchronous>, transform_indices = @transform_8, window_bounds = array<i64: 8, 128>}]} {
    %c0_i32 = arith.constant 0 : i32
    %0 = arith.cmpi eq, %arg2, %c0_i32 : i32
    %1 = arith.extui %0 : i1 to i32
    %c0_i32_0 = arith.constant 0 : i32
    %2 = arith.cmpi ne, %1, %c0_i32_0 : i32
    scf.if %2 {
      %cst = arith.constant 0.000000e+00 : f32
      %26 = vector.broadcast %cst : f32 to vector<128x128xf32>
      %c0 = arith.constant 0 : index
      %c0_13 = arith.constant 0 : index
      %27 = vector.load %arg13[%c0, %c0_13] : memref<128x128xf32, #tpu.memory_space<vmem>>, vector<128x128xf32>
      tpu.vector_store %arg13[%c0, %c0_13], %26 {strides = array<i32>} : memref<128x128xf32, #tpu.memory_space<vmem>>, vector<128x128xf32>,
    } else {
    }
    %c0_i32_1 = arith.constant 0 : i32
    %3 = arith.cmpi eq, %arg0, %c0_i32_1 : i32
    %c0_i32_2 = arith.constant 0 : i32
    %4 = arith.cmpi eq, %arg1, %c0_i32_2 : i32
    %5 = arith.andi %3, %4 : i1
    %c0_i32_3 = arith.constant 0 : i32
    %6 = arith.cmpi eq, %arg2, %c0_i32_3 : i32
    %7 = arith.andi %5, %6 : i1
    %8 = arith.extui %7 : i1 to i32
    %c0_i32_4 = arith.constant 0 : i32
    %9 = arith.cmpi ne, %8, %c0_i32_4 : i32
    scf.if %9 {
      %cst = arith.constant 0.000000e+00 : f32
      %26 = vector.broadcast %cst : f32 to vector<8x128xf32>
      %c0 = arith.constant 0 : index
      %c0_13 = arith.constant 0 : index
      %27 = vector.load %arg11[%c0, %c0_13] : memref<8x128xf32, #tpu.memory_space<vmem>>, vector<8x128xf32>
      tpu.vector_store %arg11[%c0, %c0_13], %26 {strides = array<i32>} : memref<8x128xf32, #tpu.memory_space<vmem>>, vector<8x128xf32>,
    } else {
    }
    %c0_i32_5 = arith.constant 0 : i32
    %10 = arith.cmpi eq, %arg0, %c0_i32_5 : i32
    %11 = arith.extui %10 : i1 to i32
    %c0_i32_6 = arith.constant 0 : i32
    %12 = arith.cmpi ne, %11, %c0_i32_6 : i32
    scf.if %12 {
      %c0 = arith.constant 0 : index
      %c0_13 = arith.constant 0 : index
      %26 = vector.load %arg13[%c0, %c0_13] : memref<128x128xf32, #tpu.memory_space<vmem>>, vector<128x128xf32>
      %c0_14 = arith.constant 0 : index
      %c0_15 = arith.constant 0 : index
      %27 = vector.load %arg3[%c0_14, %c0_15] : memref<128x128xbf16, #tpu.memory_space<vmem>>, vector<128x128xbf16>
      %c0_16 = arith.constant 0 : index
      %c0_17 = arith.constant 0 : index
      %28 = vector.load %arg4[%c0_16, %c0_17] : memref<128x128xbf16, #tpu.memory_space<vmem>>, vector<128x128xbf16>
      %cst = arith.constant dense<0.000000e+00> : vector<128x128xf32>
      %29 = tpu.matmul %27, %28, %cst {dimension_numbers = #tpu.dot_dimension_numbers<[1], [0], [0], [1], [0, 0, 1, 1], [], []>} : vector<128x128xbf16>, vector<128x128xbf16>, vector<128x128xf32> -> vector<128x128xf32>
      %30 = arith.addf %26, %29 : vector<128x128xf32>
      %c0_18 = arith.constant 0 : index
      %c0_19 = arith.constant 0 : index
      %31 = vector.load %arg13[%c0_18, %c0_19] : memref<128x128xf32, #tpu.memory_space<vmem>>, vector<128x128xf32>
      tpu.vector_store %arg13[%c0_18, %c0_19], %30 {strides = array<i32>} : memref<128x128xf32, #tpu.memory_space<vmem>>, vector<128x128xf32>,
    } else {
    }
    %c1_i32 = arith.constant 1 : i32
    %13 = arith.cmpi eq, %arg0, %c1_i32 : i32
    %14 = arith.extui %13 : i1 to i32
    %c0_i32_7 = arith.constant 0 : i32
    %15 = arith.cmpi ne, %14, %c0_i32_7 : i32
    scf.if %15 {
      %c128_i32 = arith.constant 128 : i32
      %26 = arith.muli %arg2, %c128_i32 : i32
      %27 = tpu.assume_multiple %26, 128 : i32
      %c0 = arith.constant 0 : index
      %c0_13 = arith.constant 0 : index
      %28 = vector.load %arg13[%c0, %c0_13] : memref<128x128xf32, #tpu.memory_space<vmem>>, vector<128x128xf32>
      %c0_14 = arith.constant 0 : index
      %c0_15 = arith.constant 0 : index
      %29 = vector.load %arg3[%c0_14, %c0_15] : memref<128x128xbf16, #tpu.memory_space<vmem>>, vector<128x128xbf16>
      %30 = arith.index_cast %27 : i32 to index
      %c0_16 = arith.constant 0 : index
      %31 = vector.load %arg12[%30, %c0_16] : memref<384x128xbf16, #tpu.memory_space<vmem>>, vector<128x128xbf16>
      %cst = arith.constant dense<0.000000e+00> : vector<128x128xf32>
      %32 = tpu.matmul %29, %31, %cst {dimension_numbers = #tpu.dot_dimension_numbers<[1], [0], [0], [1], [0, 0, 1, 1], [], []>} : vector<128x128xbf16>, vector<128x128xbf16>, vector<128x128xf32> -> vector<128x128xf32>
      %33 = arith.addf %28, %32 : vector<128x128xf32>
      %c0_17 = arith.constant 0 : index
      %c0_18 = arith.constant 0 : index
      %34 = vector.load %arg13[%c0_17, %c0_18] : memref<128x128xf32, #tpu.memory_space<vmem>>, vector<128x128xf32>
      tpu.vector_store %arg13[%c0_17, %c0_18], %33 {strides = array<i32>} : memref<128x128xf32, #tpu.memory_space<vmem>>, vector<128x128xf32>,
    } else {
    }
    %c0_i32_8 = arith.constant 0 : i32
    %16 = arith.cmpi eq, %arg0, %c0_i32_8 : i32
    %c2_i32 = arith.constant 2 : i32
    %17 = arith.cmpi eq, %arg2, %c2_i32 : i32
    %18 = arith.andi %16, %17 : i1
    %19 = arith.extui %18 : i1 to i32
    %c0_i32_9 = arith.constant 0 : i32
    %20 = arith.cmpi ne, %19, %c0_i32_9 : i32
    scf.if %20 {
      %c0 = arith.constant 0 : index
      %c0_13 = arith.constant 0 : index
      %26 = vector.load %arg13[%c0, %c0_13] : memref<128x128xf32, #tpu.memory_space<vmem>>, vector<128x128xf32>
      %c0_14 = arith.constant 0 : index
      %c0_15 = arith.constant 0 : index
      %27 = vector.load %arg6[%c0_14, %c0_15] : memref<1x128xf32, #tpu.memory_space<vmem>>, vector<1x128xf32>
      %28 = vector.broadcast %27 : vector<1x128xf32> to vector<128x128xf32>
      %29 = arith.addf %26, %28 : vector<128x128xf32>
      %cst = arith.constant 0.000000e+00 : f32
      %30 = vector.broadcast %cst : f32 to vector<128x128xf32>
      %31 = arith.maximumf %29, %30 : vector<128x128xf32>
      %c0_16 = arith.constant 0 : index
      %c0_17 = arith.constant 0 : index
      %32 = vector.load %arg8[%c0_16, %c0_17] : memref<128x128xf32, #tpu.memory_space<vmem>>, vector<128x128xf32>
      %33 = arith.addf %31, %32 : vector<128x128xf32>
      %c128_i32 = arith.constant 128 : i32
      %34 = arith.muli %arg1, %c128_i32 : i32
      %35 = tpu.assume_multiple %34, 128 : i32
      %36 = arith.truncf %33 : vector<128x128xf32> to vector<128x128xbf16>
      %c0_18 = arith.constant 0 : index
      %c0_19 = arith.constant 0 : index
      %37 = vector.load %arg5[%c0_18, %c0_19] : memref<128x128xbf16, #tpu.memory_space<vmem>>, vector<128x128xbf16>
      %cst_20 = arith.constant dense<0.000000e+00> : vector<128x128xf32>
      %38 = tpu.matmul %36, %37, %cst_20 {dimension_numbers = #tpu.dot_dimension_numbers<[1], [0], [0], [1], [0, 0, 1, 1], [], []>} : vector<128x128xbf16>, vector<128x128xbf16>, vector<128x128xf32> -> vector<128x128xf32>
      %39 = arith.truncf %38 : vector<128x128xf32> to vector<128x128xbf16>
      %40 = arith.index_cast %35 : i32 to index
      %c0_21 = arith.constant 0 : index
      %41 = vector.load %arg12[%40, %c0_21] : memref<384x128xbf16, #tpu.memory_space<vmem>>, vector<128x128xbf16>
      tpu.vector_store %arg12[%40, %c0_21], %39 {strides = array<i32>} : memref<384x128xbf16, #tpu.memory_space<vmem>>, vector<128x128xbf16>,
      %c0_22 = arith.constant 0 : index
      %c0_23 = arith.constant 0 : index
      %42 = vector.load %arg10[%c0_22, %c0_23] : memref<128x128xf32, #tpu.memory_space<vmem>>, vector<128x128xf32>
      tpu.vector_store %arg10[%c0_22, %c0_23], %33 {strides = array<i32>} : memref<128x128xf32, #tpu.memory_space<vmem>>, vector<128x128xf32>,
    } else {
    }
    %c1_i32_10 = arith.constant 1 : i32
    %21 = arith.cmpi eq, %arg0, %c1_i32_10 : i32
    %c2_i32_11 = arith.constant 2 : i32
    %22 = arith.cmpi eq, %arg2, %c2_i32_11 : i32
    %23 = arith.andi %21, %22 : i1
    %24 = arith.extui %23 : i1 to i32
    %c0_i32_12 = arith.constant 0 : i32
    %25 = arith.cmpi ne, %24, %c0_i32_12 : i32
    scf.if %25 {
      %c0 = arith.constant 0 : index
      %c0_13 = arith.constant 0 : index
      %26 = vector.load %arg13[%c0, %c0_13] : memref<128x128xf32, #tpu.memory_space<vmem>>, vector<128x128xf32>
      %c0_14 = arith.constant 0 : index
      %c0_15 = arith.constant 0 : index
      %27 = vector.load %arg7[%c0_14, %c0_15] : memref<1x128xf32, #tpu.memory_space<vmem>>, vector<1x128xf32>
      %28 = vector.broadcast %27 : vector<1x128xf32> to vector<128x128xf32>
      %29 = arith.addf %26, %28 : vector<128x128xf32>
      %cst = arith.constant 0.000000e+00 : f32
      %30 = vector.broadcast %cst : f32 to vector<128x128xf32>
      %31 = arith.maximumf %29, %30 : vector<128x128xf32>
      %c0_16 = arith.constant 0 : index
      %c0_17 = arith.constant 0 : index
      %32 = vector.load %arg10[%c0_16, %c0_17] : memref<128x128xf32, #tpu.memory_space<vmem>>, vector<128x128xf32>
      tpu.vector_store %arg10[%c0_16, %c0_17], %31 {strides = array<i32>} : memref<128x128xf32, #tpu.memory_space<vmem>>, vector<128x128xf32>,
      %c0_18 = arith.constant 0 : index
      %c0_19 = arith.constant 0 : index
      %33 = vector.load %arg11[%c0_18, %c0_19] : memref<8x128xf32, #tpu.memory_space<vmem>>, vector<8x128xf32>
      %c0_20 = arith.constant 0 : index
      %c0_21 = arith.constant 0 : index
      %34 = vector.load %arg9[%c0_20, %c0_21] : memref<8x128xf32, #tpu.memory_space<vmem>>, vector<8x128xf32>
      %cst_22 = arith.constant dense<0.000000e+00> : vector<8x128xf32>
      %35 = tpu.matmul %34, %31, %cst_22 {dimension_numbers = #tpu.dot_dimension_numbers<[1], [0], [0], [1], [0, 0, 1, 1], [], []>} : vector<8x128xf32>, vector<128x128xf32>, vector<8x128xf32> -> vector<8x128xf32>
      %36 = arith.addf %33, %35 : vector<8x128xf32>
      %c0_23 = arith.constant 0 : index
      %c0_24 = arith.constant 0 : index
      %37 = vector.load %arg11[%c0_23, %c0_24] : memref<8x128xf32, #tpu.memory_space<vmem>>, vector<8x128xf32>
      tpu.vector_store %arg11[%c0_23, %c0_24], %36 {strides = array<i32>} : memref<8x128xf32, #tpu.memory_space<vmem>>, vector<8x128xf32>,
    } else {
    }
    return
  }
  func.func @transform_0(%arg0: i32, %arg1: i32, %arg2: i32) -> (i32, i32) {
    %c0_i32 = arith.constant 0 : i32
    return %arg1, %arg2 : i32, i32
  }
  func.func @transform_1(%arg0: i32, %arg1: i32, %arg2: i32) -> (i32, i32) {
    %c0_i32 = arith.constant 0 : i32
    %c0_i32_0 = arith.constant 0 : i32
    return %arg2, %c0_i32 : i32, i32
  }
  func.func @transform_2(%arg0: i32, %arg1: i32, %arg2: i32) -> (i32, i32) {
    %c0_i32 = arith.constant 0 : i32
    %c0_i32_0 = arith.constant 0 : i32
    %c0_i32_1 = arith.constant 0 : i32
    return %c0_i32, %c0_i32_0 : i32, i32
  }
  func.func @transform_3(%arg0: i32, %arg1: i32, %arg2: i32) -> (i32, i32) {
    %c0_i32 = arith.constant 0 : i32
    %c0_i32_0 = arith.constant 0 : i32
    %c0_i32_1 = arith.constant 0 : i32
    return %c0_i32, %c0_i32_0 : i32, i32
  }
  func.func @transform_4(%arg0: i32, %arg1: i32, %arg2: i32) -> (i32, i32) {
    %c0_i32 = arith.constant 0 : i32
    %c0_i32_0 = arith.constant 0 : i32
    %c0_i32_1 = arith.constant 0 : i32
    return %c0_i32, %c0_i32_0 : i32, i32
  }
  func.func @transform_5(%arg0: i32, %arg1: i32, %arg2: i32) -> (i32, i32) {
    %c0_i32 = arith.constant 0 : i32
    %c0_i32_0 = arith.constant 0 : i32
    return %arg1, %c0_i32 : i32, i32
  }
  func.func @transform_6(%arg0: i32, %arg1: i32, %arg2: i32) -> (i32, i32) {
    %c0_i32 = arith.constant 0 : i32
    %c0_i32_0 = arith.constant 0 : i32
    return %c0_i32, %arg1 : i32, i32
  }
  func.func @transform_7(%arg0: i32, %arg1: i32, %arg2: i32) -> (i32, i32) {
    %c0_i32 = arith.constant 0 : i32
    %c0_i32_0 = arith.constant 0 : i32
    return %arg1, %c0_i32 : i32, i32
  }
  func.func @transform_8(%arg0: i32, %arg1: i32, %arg2: i32) -> (i32, i32) {
    %c0_i32 = arith.constant 0 : i32
    %c0_i32_0 = arith.constant 0 : i32
    %c0_i32_1 = arith.constant 0 : i32
    return %c0_i32, %c0_i32_0 : i32, i32
  }
}

</mosaic_0001>

<bundles_post_ra>
// kernel: tpu_custom_call.1
= control target key start
LH: loop header
LB: loop body
LE: loop exit
PB: predicated region body
PF: predicated region fallthrough
CT: control target
= control target key end

     0   :  { %s3041_s0 = inlined_call_operand.hbm [shape: bf16[384,384], index: 0, kind: input, shape index: {}]   ;;  %s3042_s1 = inlined_call_operand.hbm [shape: bf16[384,128], index: 1, kind: input, shape index: {}]   ;;  %s3043_s2 = inlined_call_operand.hbm [shape: bf16[128,128], index: 2, kind: input, shape index: {}]   ;;  %s3044_s3 = inlined_call_operand.vmem [shape: f32[1,128], index: 3, kind: input, shape index: {}]   ;;  %s3045_s4 = inlined_call_operand.vmem [shape: f32[1,128], index: 4, kind: input, shape index: {}]   ;;  %s3046_s5 = inlined_call_operand.hbm [shape: f32[384,128], index: 5, kind: input, shape index: {}]   ;;  %s3047_s6 = inlined_call_operand.hbm [shape: f32[8,384], index: 6, kind: input, shape index: {}]   ;;  %s3048_s7 = inlined_call_operand.hbm [shape: f32[384,128], index: 7, kind: output, shape index: {0}]   ;;  %s3049_s8 = inlined_call_operand.hbm [shape: f32[8,128], index: 8, kind: output, shape index: {1}]  }
   0x1   :  { %3077 = sst [smem:[#allocation38_spill]] %s3041_s0 }
   0x2   :  { %3078 = sst [smem:[#allocation39_spill]] %s3042_s1 }
   0x3   :  { %3079 = sst [smem:[#allocation40_spill]] %s3043_s2 }
   0x4   :  { %3080 = sst [smem:[#allocation41_spill]] %s3044_s3 }
   0x5   :  { %3081 = sst [smem:[#allocation42_spill]] %s3045_s4 }
   0x6   :  { %3082 = sst [smem:[#allocation43_spill]] %s3046_s5 }
   0x7   :  { %3083 = sst [smem:[#allocation44_spill]] %s3048_s7 }
   0x8   :  { %3084 = sst [smem:[#allocation45_spill]] %s3049_s8 }
   0x9   :  { %14 = vsyncpa [#allocation5], 0 }
   0xa   :  { %16 = vsyncpa [#allocation5 + $0x1], 0 }
   0xb   :  { %17 = vsyncpa [#allocation8], 0 }
   0xc   :  { %19 = vsyncpa [#allocation8 + $0x1], 0 }
   0xd   :  { %20 = vsyncpa [#allocation11], 0 }
   0xe   :  { %22 = vsyncpa [#allocation11 + $0x1], 0 }
   0xf   :  { %23 = vsyncpa [#allocation6], 0 }
  0x10   :  { %25 = vsyncpa [#allocation6 + $0x1], 0 }
  0x11   :  { %26 = vsyncpa [#allocation15], 0  ;;  %s2510_s27 = smov 0   ;;  %s2512_s28 = smov 0  }
  0x12   :  { %s2514_s29 = smov 0   ;;  %s2516_s30 = smov 0  }
  0x13   :  { %s2518_s9 = smov 0   ;;  %s2520_s10 = smov 0  }
  0x14   :  { %s2522_s11 = smov 0   ;;  %s2524_s12 = smov 0  }
  0x15   :  { %s2526_s13 = smov 0   ;;  %s2528_s14 = smov 0  }
  0x16   :  { %s2530_s15 = smov 0   ;;  %s2532_s16 = smov 0  }
  0x17   :  { %s2534_s17 = smov 0   ;;  %s2536_s18 = smov 0  }
  0x18   :  { %s2538_s19 = smov 0   ;;  %s2540_s20 = smov 0  }
  0x19 LB: > { %3085 = sst [smem:[#allocation22_spill]] %s2392_s27  ;;  %s2591_s21 = sadd.s32 4294967295, %s2452_s20   ;;  %s2452_s20 = sphi %s2540_s20, %s32_s20   ;;  %s2448_s19 = sphi %s2538_s19, %s3171_s19   ;;  %s2444_s18 = sphi %s2536_s18, %s3170_s18   ;;  %s2440_s17 = sphi %s2534_s17, %s3169_s17   ;;  %s2436_s16 = sphi %s2532_s16, %s3154_s16   ;;  %s2432_s15 = sphi %s2530_s15, %s3168_s15   ;;  %s2428_s14 = sphi %s2528_s14, %s3167_s14   ;;  %s2424_s13 = sphi %s2526_s13, %s3166_s13   ;;  %s2420_s12 = sphi %s2524_s12, %s3165_s12   ;;  %s2416_s11 = sphi %s2522_s11, %s3164_s11   ;;  %s2412_s10 = sphi %s2520_s10, %s3163_s10   ;;  %s2408_s9 = sphi %s2518_s9, %s3162_s9   ;;  %s2404_s30 = sphi %s2516_s30, %s3161_s30   ;;  %s2400_s29 = sphi %s2514_s29, %s3160_s29   ;;  %s2396_s28 = sphi %s2512_s28, %s3159_s28   ;;  %s2392_s27 = sphi %s2510_s27, %s3150_s27  }
  0x1a   : > { %3086 = sst [smem:[#allocation23_spill]] %s2396_s28  ;;  %p1551_p0 = scmp.ge.s32.totalorder %s2452_s20, 1 }
  0x1b   : > { %3087 = sst [smem:[#allocation24_spill]] %s2424_s13  ;;  %p74_p1 = scmp.eq.s32.totalorder %s2591_s21, 0 }
  0x1c   : > { %3088 = sst [smem:[#allocation25_spill]] %s2428_s14  ;;  %p272_p2 = scmp.lt.s32.totalorder %s2452_s20, 19 }
  0x1d   : > { %3089 = sst [smem:[#allocation26_spill]] %s2432_s15  ;;  %s2454_s26 = smov [#allocation9]  }
  0x1e   : > { %3090 = sst [smem:[#allocation27_spill]] %s2436_s16  ;;  %p2599_p3 = pnand %p1551_p0, %p272_p2 }
  0x1f   : > { %3091 = sst [smem:[#allocation28_spill]] %s2448_s19  ;;  %s285_s8 = sshll.u32 %s2454_s26, 4  ;;  %s286_s8 = int_to_ptr.vmem [resolvable:$true] %s285_s8 }
  0x20   : > { %s3092_s2 = sld [smem:[#allocation40_spill]]  ;;  %p1928_p4 = pneg %p2599_p3 }
  0x21   : > { %s3051_s22 = smov 64   ;;  %s3053_s23 = smov 4  }
  0x22   : > { %p1929_p5 = pnand %p1928_p4, %p74_p1  ;;  %p3064_p6 = scmp.eq.s32.totalorder %s2452_s20, 0 }
  0x23   : > { %p182_p7 = scmp.ne.s32.totalorder %s2400_s29, %s2396_s28  ;;  %p188_p8 = scmp.ne.s32.totalorder %s2396_s28, %s2392_s27 }
  0x24   : > { %p3063_p9 = scmp.eq.s32.totalorder %s2591_s21, 17  ;;  %p3065_p2 = scmp.lt.s32.totalorder %s2452_s20, 18 }
  0x25   : > { %p2621_p10 = por %p182_p7, %p3064_p6  ;;  %p2627_p12 = por %p188_p8, %p74_p1 }
  0x26   : > { %s283_s24 = sshll.u32 %s3092_s2, 4  ;;  %s1550_s2 = sadd.s32 4294967294, %s2452_s20   ;;  %s284_s24 = int_to_ptr.hbm [resolvable:$true] %s283_s24 }
  0x27   : > { %1931 = dma.hbm_to_vmem [thread:$0]  (!%p1929_p5), %s284_s24, 1024, %s286_s8, [#allocation8], %s3051_s22, %s3051_s22, %s3053_s23  }
  0x28   : > { %p244_p11 = scmp.eq.s32.totalorder %s1550_s2, 17  ;;  %p2633_p13 = por %p3063_p9, %p182_p7 }
  0x29   : > { %s3095_s8 = scalar_select %p2627_p12, 1, 0 }
  0x2a   : > { %s3097_s24 = scalar_select %p2633_p13, 1, 0 }
  0x2b   : > { %3096 = sst [smem:[#allocation29_spill]] %s3095_s8  ;;  %p2637_p0 = por %p244_p11, %p188_p8 }
  0x2c   : > { %3098 = sst [smem:[#allocation30_spill]] %s3097_s24  ;;  %s3062_s23 = sand.u32 1, %s2452_s20  }
  0x2d   : > { %s3099_s22 = scalar_select %p2637_p0, 1, 0 }
  0x2e   : > { %s3061_s2 = sand.u32 1, %s2400_s29   ;;  %s1748_s7 = sshll.u32 %s2444_s18, 7 }
  0x2f   : > { %3100 = sst [smem:[#allocation31_spill]] %s3099_s22  ;;  %s1561_s4 = sshll.u32 %s3061_s2, 7 }
  0x30   : > { %s3101_s5 = sld [smem:[#allocation43_spill]]  ;;  %s355_s16 = scalar_lea.vmem [#allocation10], %s1561_s4 }
  0x31   : > { %s363_s22 = sshll.u32 %s355_s16, 4  ;;  %p2654_p4 = pnand %p3065_p2, %p2621_p10  ;;  %s364_s22 = int_to_ptr.vmem [resolvable:$true] %s363_s22 }
  0x32   : > { %s2660_s3 = scalar_lea.sflag [#allocation11], %s3062_s23  ;;  %s2457_s4 = smov 128  }
  0x33   : > { %s44_s27 = sadd.s32 1, %s2440_s17  ;;  %s60_s16 = sadd.s32 1, %s2424_s13 }
  0x34   : > { %p45_p5 = scmp.ge.s32.totalorder %s44_s27, 3  ;;  %p67_p7 = scmp.ne.s32.totalorder %s2424_s13, %s2420_s12 }
  0x35   : > { %p73_p8 = scmp.ne.s32.totalorder %s2420_s12, %s2416_s11  ;;  %s3104_s26 = sadd.s32 1, %s2444_s18 }
  0x36   : > { %s360_s15 = scalar_lea.hbm %s3101_s5, %s1748_s7  ;;  %s2458_s7 = smov 8  }
  0x37   : > { %s361_s24 = sshll.u32 %s360_s15, 4  ;;  %s51_s15 = sadd.s32 1, %s2448_s19  ;;  %s362_s24 = int_to_ptr.hbm [resolvable:$true] %s361_s24 }
  0x38   : > { %1941 = dma.hbm_to_vmem [thread:$0]  (!%p2654_p4), %s362_s24, 2048, %s364_s22, %s2660_s3, %s2457_s4, %s2457_s4, %s2458_s7  }
  0x39   : > { %s3173_s27 = smov (%p45_p5, %s44_s27), 0  ;;  %s3175_s26 = smov (!%p45_p5, %s3104_s26), %s2444_s18 }
  0x3a   : > { %3103 = sst [smem:[#allocation32_spill]] %s3173_s27  ;;  %s2679_s23 = ssub.s32 %s2440_s17, %s3173_s27 }
  0x3b   : > { %p2683_p10 = por %p3064_p6, %p67_p7  ;;  %p49_p11 = scmp.ge.s32.totalorder %s3175_s26, 3 }
  0x3c   : > { %p2689_p9 = por %p74_p1, %p73_p8  ;;  %p84_p5 = scmp.eq.s32.totalorder %s2679_s23, 0 }
  0x3d   : > { %s305_s24 = sand.u32 1, %s2424_s13   ;;  %s3177_s26 = smov (%p49_p11, %s3175_s26), 0 }
  0x3e   : > { %s3106_s11 = scalar_select %p2689_p9, 1, 0 }
  0x3f   : > { %3108 = sst [smem:[#allocation34_spill]] %s3177_s26  ;;  %s3179_s15 = smov (!%p49_p11, %s51_s15), %s2448_s19 }
  0x40   : > { %3107 = sst [smem:[#allocation33_spill]] %s3106_s11  ;;  %s55_s4 = ssub.s32 %s2444_s18, %s3177_s26 }
  0x41   : > { %p53_p7 = scmp.ge.s32.totalorder %s3179_s15, 2  ;;  %s57_s7 = sor.u32 %s2679_s23, %s55_s4 }
  0x42   : > { %p58_p6 = scmp.eq.s32.totalorder %s57_s7, 0  ;;  %p173_p2 = scmp.eq.s32.totalorder %s55_s4, 0 }
  0x43   : > { %s3181_s15 = smov (%p53_p7, %s3179_s15), 0  ;;  %s3111_s27 = sadd.s32 1, %s2400_s29 }
  0x44   : > { %3109 = sst [smem:[#allocation35_spill]] %s3181_s15  ;;  %s1554_s8 = sshll.u32 %s305_s24, 6 }
  0x45   : > { %s2704_s5 = scalar_select %p58_p6, %s2424_s13, %s60_s16  }
  0x46   : > { %s2709_s14 = scalar_select %p173_p2, %s2400_s29, %s3111_s27  }
  0x47   : > { %3110 = sst [smem:[#allocation36_spill]] %s2704_s5  ;;  %s1909_s28 = smul.u32 48, %s2444_s18 }
  0x48   : > { %3112 = sst [smem:[#allocation37_spill]] %s2709_s14  ;;  %p3113_p8 = scmp.lt.s32.totalorder %s2452_s20, 18 }
  0x49   : > { %s314_s4 = sadd.s32 %s2440_s17, %s1909_s28  ;;  %s309_s16 = scalar_lea.vmem [#allocation4], %s1554_s8 }
  0x4a   : > { %p1933_p11 = pnand %p3113_p8, %p2683_p10  ;;  %s319_s7 = sshll.u32 %s309_s16, 4  ;;  %s320_s7 = int_to_ptr.vmem [resolvable:$true] %s319_s7 }
  0x4b   : > { %s1557_s27 = sshll.u32 %s314_s4, 2  ;;  %s3114_s0 = sld [smem:[#allocation38_spill]] }
  0x4c   : > { %s306_s22 = scalar_lea.sflag [#allocation5], %s305_s24  ;;  %s2459_s13 = smov 192  }
  0x4d   : > { %s3115_s14 = smov 4   ;;  %s3116_s11 = smov 64  }
  0x4e   : > { %s86_s28 = sadd.s32 1, %s2412_s10  ;;  %p93_p6 = scmp.ne.s32.totalorder %s2412_s10, %s2408_s9 }
  0x4f   : > { %s2726_s8 = scalar_select %p84_p5, %s2412_s10, %s86_s28  }
  0x50   : > { %p99_p2 = scmp.ne.s32.totalorder %s2408_s9, %s2404_s30  ;;  %s331_s4 = sand.u32 1, %s2412_s10  }
  0x51   : > { %s316_s19 = scalar_lea.hbm %s3114_s0, %s1557_s27  ;;  %s1747_s15 = sshll.u32 %s2440_s17, 6 }
  0x52   : > { %s317_s5 = sshll.u32 %s316_s19, 4  ;;  %p3117_p10 = scmp.eq.s32.totalorder %s2452_s20, 0  ;;  %s318_s5 = int_to_ptr.hbm [resolvable:$true] %s317_s5 }
  0x53   : > { %1935 = dma.hbm_to_vmem [thread:$0]  (!%p1933_p11), %s318_s5, 1024, %s320_s7, %s306_s22, %s2459_s13, %s3116_s11, %s3115_s14  }
  0x54   : > { %p95_p7 = por %p93_p6, %p3117_p10  ;;  %p2738_p8 = por %p99_p2, %p74_p1 }
  0x55   : > { %s1558_s5 = sshll.u32 %s331_s4, 6  ;;  %s3119_s1 = sld [smem:[#allocation39_spill]] }
  0x56   : > { %s333_s16 = scalar_lea.vmem [#allocation7], %s1558_s5  ;;  %p3120_p5 = scmp.lt.s32.totalorder %s2452_s20, 18 }
  0x57   : > { %s341_s30 = sshll.u32 %s333_s16, 4  ;;  %s3121_s7 = sand.u32 1, %s2400_s29   ;;  %s342_s30 = int_to_ptr.vmem [resolvable:$true] %s341_s30 }
  0x58   : > { %p1936_p11 = pnand %p3120_p5, %p95_p7  ;;  %s1564_s27 = sshll.u32 %s3121_s7, 3 }
  0x59   : > { %s1565_s22 = sshll.u32 %s2444_s18, 3  ;;  %s3122_s28 = sand.u32 1, %s2452_s20  }
  0x5a   : > { %s330_s0 = scalar_lea.sflag [#allocation8], %s3122_s28  ;;  %s381_s13 = scalar_lea.hbm %s3047_s6, %s1565_s22 }
  0x5b   : > { %s338_s23 = scalar_lea.hbm %s3119_s1, %s1747_s15  ;;  %s377_s26 = scalar_lea.vmem [#allocation12], %s1564_s27 }
  0x5c   : > { %s339_s24 = sshll.u32 %s338_s23, 4  ;;  %s385_s23 = sshll.u32 %s377_s26, 4  ;;  %s340_s24 = int_to_ptr.hbm [resolvable:$true] %s339_s24  ;;  %s386_s23 = int_to_ptr.vmem [resolvable:$true] %s385_s23 }
  0x5d   : > { %1938 = dma.hbm_to_vmem [thread:$0]  (!%p1936_p11), %s340_s24, 1024, %s342_s30, %s330_s0, %s3116_s11, %s3116_s11, %s3115_s14  }
  0x5e   : > { %s383_s5 = sshll.u32 %s381_s13, 4  ;;  %394 = sbr.rel (%p2599_p3) target bundleno = 997 (0x3e5), region = 48  ;;  %s384_s5 = int_to_ptr.hbm [resolvable:$true] %s383_s5 }
  0x5f   : > { %1944 = dma.hbm_to_vmem [thread:$0]  (!%p2654_p4), %s384_s5, 128, %s386_s23, %s2660_s3  }
  0x60   : > { %s396_s7 = sand.u32 (!%p2599_p3), 1, %s2420_s12  }
  0x61   : > { %s1567_s28 = sshll.u32 (!%p2599_p3), %s396_s7, 6  ;;  %s397_s1 = scalar_lea.sflag (!%p2599_p3), [#allocation5], %s396_s7 }
  0x62   : > { %s2764_s0 = scalar_lea.vmem (!%p2599_p3), [#allocation4], %s1567_s28 }
  0x63   : > { %2367 = dma.done.wait (%p2689_p9), %s397_s1, 1024  }
  0x64   : > { %2369 = vsyncadd (%p2689_p9), %s397_s1, 4294966272  ;;  %s406_s14 = sand.u32 1, %s2591_s21   ;;  %s408_s2 = sand.u32 1, %s2408_s9  }
  0x65   : > { %s1568_s3 = sshll.u32 %s408_s2, 6  ;;  %s407_s25 = scalar_lea.sflag [#allocation8], %s406_s14 }
  0x66   : > { %s2772_s11 = scalar_lea.vmem [#allocation7], %s1568_s3 }
  0x67   : > { %2371 = dma.done.wait (%p2738_p8), %s407_s25, 1024  }
  0x68   : > { %2373 = vsyncadd (%p2738_p8), %s407_s25, 4294966272 }
  0x69   : > { %2375 = dma.done.wait (%p74_p1), [#allocation8], 1024  }
  0x6a   : > { %2377 = vsyncadd (%p74_p1), [#allocation8], 4294966272  ;;  %s3124_s1 = sld [smem:[#allocation23_spill]]  ;;  %s422_s22 = scalar_lea.sflag [#allocation11], %s406_s14 }
  0x70   : > { %s2783_s30 = sand.u32 1, %s3124_s1  }
  0x71   : > { %s1570_s27 = sshll.u32 %s2783_s30, 7 }
  0x72   : > { %s2786_s4 = scalar_lea.vmem [#allocation10], %s1570_s27 }
  0x73   : > { %2379 = dma.done.wait (%p2627_p12), %s422_s22, 2176  }
  0x74   : > { %2381 = vsyncadd (%p2627_p12), %s422_s22, 4294965120  ;;  %s3126_s19 = sld [smem:[#allocation25_spill]]  ;;  %s1571_s15 = sshll.u32 %s2783_s30, 3 }
  0x75   : > { %s2794_s13 = scalar_lea.vmem [#allocation12], %s1571_s15  ;;  %s2796_s26 = scalar_lea.vmem [#allocation13], %s1570_s27 }
  0x7a   : > { %p488_p3 = scmp.eq.s32.totalorder %s3126_s19, 0  ;;  %p1573_p1 = scmp.ne.s32.totalorder %s3126_s19, 0 }
  0x7c   : > { %491 = sbr.rel (%p1573_p1) target bundleno = 146 (0x92), region = 72 }
  0x81   : > { %v2460_v0 = vmov 0.0  }
  0x82   : > { %492 = vst [vmem:[#allocation3 + $0x30] sm:$0xff] %v2460_v0 }
  0x83   : > { %493 = vst [vmem:[#allocation3] sm:$0xff] %v2460_v0 }
  0x84   : > { %494 = vst [vmem:[#allocation3 + $0x58] sm:$0xff] %v2460_v0 }
  0x85   : > { %495 = vst [vmem:[#allocation3 + $0x18] sm:$0xff] %v2460_v0 }
  0x86   : > { %496 = vst [vmem:[#allocation3 + $0x50] sm:$0xff] %v2460_v0 }
  0x87   : > { %497 = vst [vmem:[#allocation3 + $0x68] sm:$0xff] %v2460_v0 }
  0x88   : > { %498 = vst [vmem:[#allocation3 + $0x8] sm:$0xff] %v2460_v0 }
  0x89   : > { %499 = vst [vmem:[#allocation3 + $0x48] sm:$0xff] %v2460_v0 }
  0x8a   : > { %500 = vst [vmem:[#allocation3 + $0x40] sm:$0xff] %v2460_v0 }
  0x8b   : > { %501 = vst [vmem:[#allocation3 + $0x20] sm:$0xff] %v2460_v0 }
  0x8c   : > { %502 = vst [vmem:[#allocation3 + $0x10] sm:$0xff] %v2460_v0 }
  0x8d   : > { %503 = vst [vmem:[#allocation3 + $0x38] sm:$0xff] %v2460_v0 }
  0x8e   : > { %504 = vst [vmem:[#allocation3 + $0x60] sm:$0xff] %v2460_v0 }
  0x8f   : > { %505 = vst [vmem:[#allocation3 + $0x70] sm:$0xff] %v2460_v0 }
  0x90   : > { %506 = vst [vmem:[#allocation3 + $0x78] sm:$0xff] %v2460_v0 }
  0x91   : > { %507 = vst [vmem:[#allocation3 + $0x28] sm:$0xff] %v2460_v0 }
  0x92 PF: > { %s3127_s23 = sld [smem:[#allocation27_spill]] }
  0x93   : > { %s3128_s5 = sld [smem:[#allocation26_spill]] }
  0x98   : > { %p508_p9 = scmp.eq.s32.totalorder %s3127_s23, 0 }
  0x99   : > { %p509_p12 = scmp.eq.s32.totalorder %s3128_s5, 0 }
  0x9b   : > { %p510_p4 = pnand %p509_p12, %p508_p9 }
  0x9d   : > { %p511_p6 = pneg %p510_p4 }
  0x9f   : > { %p512_p2 = pnand %p511_p6, %p488_p3 }
  0xa1   : > { %515 = sbr.rel (%p512_p2) target bundleno = 168 (0xa8), region = 76 }
  0xa6   : > { %v2461_v1 = vmov 0.0  }
  0xa7   : > { %516 = vst [vmem:[#allocation14] sm:$0xff] %v2461_v1 }
  0xa8 PF: > { %s3130_s7 = sld [smem:[#allocation27_spill]] }
  0xae   : > { %p1574_p10 = scmp.ne.s32.totalorder %s3130_s7, 0 }
  0xb0   : > { %519 = sbr.rel (%p1574_p10) target bundleno = 374 (0x176), region = 80 }
  0xb5   : > { %v1764_v2 = vld [vmem:[%s2772_s11 + $0x38] sm:$0xff]  ;;  %v1763_v3 = vld [vmem:[%s2772_s11 + $0x30] sm:$0xff]  ;;  %v1762_v4 = vld [vmem:[%s2772_s11 + $0x28] sm:$0xff] }
  0xb6   : > { %664 = vmatpush.bf16.msra.mxu0 %v1764_v2  ;;  %1837 = vmatpush.bf16.msra.mxu1 %v1764_v2  ;;  %v1761_v5 = vld [vmem:[%s2772_s11 + $0x20] sm:$0xff]  ;;  %v1760_v6 = vld [vmem:[%s2772_s11 + $0x18] sm:$0xff]  ;;  %v1759_v7 = vld [vmem:[%s2772_s11 + $0x10] sm:$0xff] }
  0xb7   : > { %1838 = vmatpush.bf16.msra.mxu2 %v1764_v2  ;;  %1839 = vmatpush.bf16.msra.mxu3 %v1764_v2  ;;  %v1758_v8 = vld [vmem:[%s2772_s11 + $0x8] sm:$0xff]  ;;  %v1757_v9 = vld [vmem:[%s2772_s11] sm:$0xff]  ;;  %v1751_v11 = vld [vmem:[%s2764_s0 + $0x10] sm:$0xff] }
  0xb8   : > { %v1749_v10 = vld [vmem:[%s2764_s0] sm:$0xff]  ;;  %v1755_v13 = vld [vmem:[%s2764_s0 + $0x30] sm:$0xff]  ;;  %v1750_v14 = vld [vmem:[%s2764_s0 + $0x8] sm:$0xff] }
  0xb9   : > { %v1753_v12 = vld [vmem:[%s2764_s0 + $0x20] sm:$0xff]  ;;  %v1752_v15 = vld [vmem:[%s2764_s0 + $0x18] sm:$0xff]  ;;  %v1754_v16 = vld [vmem:[%s2764_s0 + $0x28] sm:$0xff] }
  0xba   : > { %665 = vmatpush.bf16.msra.mxu0 %v1763_v3  ;;  %1840 = vmatpush.bf16.msra.mxu1 %v1763_v3  ;;  %v1756_v17 = vld [vmem:[%s2764_s0 + $0x38] sm:$0xff]  ;;  %v520_v18 = vld [vmem:[#allocation3 + $0x30] sm:$0xff]  ;;  %v528_v24 = vld [vmem:[#allocation3 + $0x40] sm:$0xff] }
  0xbb   : > { %1841 = vmatpush.bf16.msra.mxu2 %v1763_v3  ;;  %1842 = vmatpush.bf16.msra.mxu3 %v1763_v3  ;;  %v524_v19 = vld [vmem:[#allocation3 + $0x50] sm:$0xff]  ;;  %v532_v25 = vld [vmem:[#allocation3 + $0x60] sm:$0xff]  ;;  %v525_v27 = vld [vmem:[#allocation3 + $0x68] sm:$0xff] }
  0xbc   : > { %v521_v26 = vld [vmem:[#allocation3] sm:$0xff]  ;;  %v533_v37 = vld [vmem:[#allocation3 + $0x70] sm:$0xff]  ;;  %v522_v38 = vld [vmem:[#allocation3 + $0x58] sm:$0xff] }
  0xbd   : > { %v529_v36 = vld [vmem:[#allocation3 + $0x20] sm:$0xff]  ;;  %v526_v39 = vld [vmem:[#allocation3 + $0x8] sm:$0xff]  ;;  %v530_v48 = vld [vmem:[#allocation3 + $0x10] sm:$0xff] }
  0xbe   : > { %666 = vmatpush.bf16.msra.mxu0 %v1762_v4  ;;  %1843 = vmatpush.bf16.msra.mxu1 %v1762_v4  ;;  %v534_v49 = vld [vmem:[#allocation3 + $0x78] sm:$0xff]  ;;  %v527_v51 = vld [vmem:[#allocation3 + $0x48] sm:$0xff] }
  0xbf   : > { %1844 = vmatpush.bf16.msra.mxu2 %v1762_v4  ;;  %1845 = vmatpush.bf16.msra.mxu3 %v1762_v4  ;;  %v523_v50 = vld [vmem:[#allocation3 + $0x18] sm:$0xff]  ;;  %v535_v61 = vld [vmem:[#allocation3 + $0x28] sm:$0xff] }
  0xc0   : > { %v531_v60 = vld [vmem:[#allocation3 + $0x38] sm:$0xff] }
  0xc2   : > { %667 = vmatpush.bf16.msra.mxu0 %v1761_v5  ;;  %1846 = vmatpush.bf16.msra.mxu1 %v1761_v5 }
  0xc3   : > { %1847 = vmatpush.bf16.msra.mxu2 %v1761_v5  ;;  %1848 = vmatpush.bf16.msra.mxu3 %v1761_v5 }
  0xc6   : > { %668 = vmatpush.bf16.msra.mxu0 %v1760_v6  ;;  %1849 = vmatpush.bf16.msra.mxu1 %v1760_v6 }
  0xc7   : > { %1850 = vmatpush.bf16.msra.mxu2 %v1760_v6  ;;  %1851 = vmatpush.bf16.msra.mxu3 %v1760_v6 }
  0xca   : > { %669 = vmatpush.bf16.msra.mxu0 %v1759_v7  ;;  %1852 = vmatpush.bf16.msra.mxu1 %v1759_v7 }
  0xcb   : > { %1853 = vmatpush.bf16.msra.mxu2 %v1759_v7  ;;  %1854 = vmatpush.bf16.msra.mxu3 %v1759_v7 }
  0xce   : > { %670 = vmatpush.bf16.msra.mxu0 %v1758_v8  ;;  %1855 = vmatpush.bf16.msra.mxu1 %v1758_v8 }
  0xcf   : > { %1856 = vmatpush.bf16.msra.mxu2 %v1758_v8  ;;  %1857 = vmatpush.bf16.msra.mxu3 %v1758_v8 }
  0xd2   : > { %671 = vmatpush.bf16.msra.mxu0 %v1757_v9  ;;  %1858 = vmatpush.bf16.msra.mxu1 %v1757_v9 }
  0xd3   : > { %1859 = vmatpush.bf16.msra.mxu2 %v1757_v9  ;;  %1860 = vmatpush.bf16.msra.mxu3 %v1757_v9 }
  0xd5   : > { %672 = vmatmul.bf16.vlgmr.msra.gmra.mxu0 %v1749_v10  ;;  %682 = vmatmul.bf16.vlgmr.msra.gmra.mxu1 %v1751_v11 }
  0xd6   : > { %692 = vmatmul.bf16.vlgmr.msra.gmra.mxu2 %v1753_v12  ;;  %702 = vmatmul.bf16.vlgmr.msra.gmra.mxu3 %v1755_v13 }
  0xe5   : > { %677 = vmatmul.bf16.gmra.mxu0 %v1750_v14  ;;  %687 = vmatmul.bf16.gmra.mxu1 %v1752_v15 }
  0xe6   : > { %697 = vmatmul.bf16.gmra.mxu2 %v1754_v16  ;;  %707 = vmatmul.bf16.gmra.mxu3 %v1756_v17 }
 0x152   : > { %v673_v20 = vpop.f32.mrf.mxu0  ;;  %v683_v21 = vpop.f32.mrf.mxu1 }
 0x153   : > { %v713_v22 = vadd.f32 %v673_v20, %v520_v18  ;;  %v717_v23 = vadd.f32 %v683_v21, %v524_v19 }
 0x155   : > { %729 = vst [vmem:[#allocation3 + $0x30] sm:$0xff] %v713_v22 }
 0x156   : > { %733 = vst [vmem:[#allocation3 + $0x50] sm:$0xff] %v717_v23 }
 0x159   : > { %v693_v28 = vpop.f32.mrf.mxu2  ;;  %v703_v29 = vpop.f32.mrf.mxu3 }
 0x15a   : > { %v721_v30 = vadd.f32 %v693_v28, %v528_v24  ;;  %v725_v31 = vadd.f32 %v703_v29, %v532_v25  ;;  %v675_v32 = vpop.f32.mrf.mxu0  ;;  %v685_v33 = vpop.f32.mrf.mxu1 }
 0x15b   : > { %v714_v34 = vadd.f32 %v675_v32, %v521_v26  ;;  %v718_v35 = vadd.f32 %v685_v33, %v525_v27 }
 0x15c   : > { %737 = vst [vmem:[#allocation3 + $0x40] sm:$0xff] %v721_v30 }
 0x15d   : > { %741 = vst [vmem:[#allocation3 + $0x60] sm:$0xff] %v725_v31 }
 0x15e   : > { %730 = vst [vmem:[#allocation3] sm:$0xff] %v714_v34 }
 0x15f   : > { %734 = vst [vmem:[#allocation3 + $0x68] sm:$0xff] %v718_v35 }
 0x161   : > { %v695_v40 = vpop.f32.mrf.mxu2  ;;  %v705_v41 = vpop.f32.mrf.mxu3 }
 0x162   : > { %v722_v42 = vadd.f32 %v695_v40, %v529_v36  ;;  %v726_v43 = vadd.f32 %v705_v41, %v533_v37  ;;  %v678_v44 = vpop.f32.mrf.mxu0  ;;  %v688_v45 = vpop.f32.mrf.mxu1 }
 0x163   : > { %v715_v46 = vadd.f32 %v678_v44, %v522_v38  ;;  %v719_v47 = vadd.f32 %v688_v45, %v526_v39 }
 0x164   : > { %738 = vst [vmem:[#allocation3 + $0x20] sm:$0xff] %v722_v42 }
 0x165   : > { %742 = vst [vmem:[#allocation3 + $0x70] sm:$0xff] %v726_v43 }
 0x166   : > { %731 = vst [vmem:[#allocation3 + $0x58] sm:$0xff] %v715_v46 }
 0x167   : > { %735 = vst [vmem:[#allocation3 + $0x8] sm:$0xff] %v719_v47 }
 0x169   : > { %v698_v52 = vpop.f32.mrf.mxu2  ;;  %v708_v53 = vpop.f32.mrf.mxu3 }
 0x16a   : > { %v723_v54 = vadd.f32 %v698_v52, %v530_v48  ;;  %v727_v55 = vadd.f32 %v708_v53, %v534_v49  ;;  %v680_v56 = vpop.f32.mrf.mxu0  ;;  %v690_v57 = vpop.f32.mrf.mxu1 }
 0x16b   : > { %v716_v58 = vadd.f32 %v680_v56, %v523_v50  ;;  %v720_v59 = vadd.f32 %v690_v57, %v527_v51 }
 0x16c   : > { %739 = vst [vmem:[#allocation3 + $0x10] sm:$0xff] %v723_v54 }
 0x16d   : > { %743 = vst [vmem:[#allocation3 + $0x78] sm:$0xff] %v727_v55 }
 0x16e   : > { %732 = vst [vmem:[#allocation3 + $0x18] sm:$0xff] %v716_v58 }
 0x16f   : > { %736 = vst [vmem:[#allocation3 + $0x48] sm:$0xff] %v720_v59 }
 0x171   : > { %v700_v62 = vpop.f32.mrf.mxu2  ;;  %v710_v63 = vpop.f32.mrf.mxu3 }
 0x172   : > { %v724_v0 = vadd.f32 %v700_v62, %v531_v60  ;;  %v728_v1 = vadd.f32 %v710_v63, %v535_v61 }
 0x174   : > { %740 = vst [vmem:[#allocation3 + $0x38] sm:$0xff] %v724_v0 }
 0x175   : > { %744 = vst [vmem:[#allocation3 + $0x28] sm:$0xff] %v728_v1 }
 0x176 PF: > { %s3131_s28 = sld [smem:[#allocation27_spill]] }
 0x17c   : > { %p745_p7 = scmp.eq.s32.totalorder %s3131_s28, 1  ;;  %p1639_p8 = scmp.ne.s32.totalorder %s3131_s28, 1 }
 0x17d   : > { %s3132_s14 = sld [smem:[#allocation25_spill]] (!%p1639_p8) }
 0x17e   : > { %748 = sbr.rel (%p1639_p8) target bundleno = 584 (0x248), region = 84 }
 0x183   : > { %s1640_s2 = sshll.u32 %s3132_s14, 7  ;;  %v1765_v10 = vld [vmem:[%s2764_s0] sm:$0xff]  ;;  %v1767_v11 = vld [vmem:[%s2764_s0 + $0x10] sm:$0xff]  ;;  %v1766_v14 = vld [vmem:[%s2764_s0 + $0x8] sm:$0xff] }
 0x184   : > { %s782_s3 = sshra.s32 %s1640_s2, 3  ;;  %v1769_v12 = vld [vmem:[%s2764_s0 + $0x20] sm:$0xff]  ;;  %v1771_v13 = vld [vmem:[%s2764_s0 + $0x30] sm:$0xff]  ;;  %v1768_v15 = vld [vmem:[%s2764_s0 + $0x18] sm:$0xff] }
 0x185   : > { %s1641_s25 = sshll.u32 %s782_s3, 2  ;;  %v1770_v16 = vld [vmem:[%s2764_s0 + $0x28] sm:$0xff]  ;;  %v1772_v17 = vld [vmem:[%s2764_s0 + $0x38] sm:$0xff]  ;;  %v750_v18 = vld [vmem:[#allocation3 + $0x30] sm:$0xff] }
 0x186   : > { %s2825_s11 = scalar_lea.vmem [#allocation2], %s1641_s25  ;;  %v754_v19 = vld [vmem:[#allocation3 + $0x50] sm:$0xff]  ;;  %v758_v24 = vld [vmem:[#allocation3 + $0x40] sm:$0xff]  ;;  %v755_v27 = vld [vmem:[#allocation3 + $0x68] sm:$0xff] }
 0x187   : > { %v1780_v2 = vld [vmem:[%s2825_s11 + $0x38] sm:$0xff]  ;;  %v1779_v3 = vld [vmem:[%s2825_s11 + $0x30] sm:$0xff]  ;;  %v1778_v4 = vld [vmem:[%s2825_s11 + $0x28] sm:$0xff] }
 0x188   : > { %898 = vmatpush.bf16.msra.mxu0 %v1780_v2  ;;  %1861 = vmatpush.bf16.msra.mxu1 %v1780_v2  ;;  %v1777_v5 = vld [vmem:[%s2825_s11 + $0x20] sm:$0xff]  ;;  %v1776_v6 = vld [vmem:[%s2825_s11 + $0x18] sm:$0xff]  ;;  %v1775_v7 = vld [vmem:[%s2825_s11 + $0x10] sm:$0xff] }
 0x189   : > { %1862 = vmatpush.bf16.msra.mxu2 %v1780_v2  ;;  %1863 = vmatpush.bf16.msra.mxu3 %v1780_v2  ;;  %v1774_v8 = vld [vmem:[%s2825_s11 + $0x8] sm:$0xff]  ;;  %v1773_v9 = vld [vmem:[%s2825_s11] sm:$0xff]  ;;  %v763_v37 = vld [vmem:[#allocation3 + $0x70] sm:$0xff] }
 0x18a   : > { %v762_v25 = vld [vmem:[#allocation3 + $0x60] sm:$0xff]  ;;  %v752_v38 = vld [vmem:[#allocation3 + $0x58] sm:$0xff]  ;;  %v756_v39 = vld [vmem:[#allocation3 + $0x8] sm:$0xff] }
 0x18b   : > { %v751_v26 = vld [vmem:[#allocation3] sm:$0xff]  ;;  %v760_v48 = vld [vmem:[#allocation3 + $0x10] sm:$0xff]  ;;  %v764_v49 = vld [vmem:[#allocation3 + $0x78] sm:$0xff] }
 0x18c   : > { %899 = vmatpush.bf16.msra.mxu0 %v1779_v3  ;;  %1864 = vmatpush.bf16.msra.mxu1 %v1779_v3  ;;  %v759_v36 = vld [vmem:[#allocation3 + $0x20] sm:$0xff]  ;;  %v753_v50 = vld [vmem:[#allocation3 + $0x18] sm:$0xff]  ;;  %v757_v51 = vld [vmem:[#allocation3 + $0x48] sm:$0xff] }
 0x18d   : > { %1865 = vmatpush.bf16.msra.mxu2 %v1779_v3  ;;  %1866 = vmatpush.bf16.msra.mxu3 %v1779_v3  ;;  %v761_v60 = vld [vmem:[#allocation3 + $0x38] sm:$0xff]  ;;  %v765_v61 = vld [vmem:[#allocation3 + $0x28] sm:$0xff] }
 0x190   : > { %900 = vmatpush.bf16.msra.mxu0 %v1778_v4  ;;  %1867 = vmatpush.bf16.msra.mxu1 %v1778_v4 }
 0x191   : > { %1868 = vmatpush.bf16.msra.mxu2 %v1778_v4  ;;  %1869 = vmatpush.bf16.msra.mxu3 %v1778_v4 }
 0x194   : > { %901 = vmatpush.bf16.msra.mxu0 %v1777_v5  ;;  %1870 = vmatpush.bf16.msra.mxu1 %v1777_v5 }
 0x195   : > { %1871 = vmatpush.bf16.msra.mxu2 %v1777_v5  ;;  %1872 = vmatpush.bf16.msra.mxu3 %v1777_v5 }
 0x198   : > { %902 = vmatpush.bf16.msra.mxu0 %v1776_v6  ;;  %1873 = vmatpush.bf16.msra.mxu1 %v1776_v6 }
 0x199   : > { %1874 = vmatpush.bf16.msra.mxu2 %v1776_v6  ;;  %1875 = vmatpush.bf16.msra.mxu3 %v1776_v6 }
 0x19c   : > { %903 = vmatpush.bf16.msra.mxu0 %v1775_v7  ;;  %1876 = vmatpush.bf16.msra.mxu1 %v1775_v7 }
 0x19d   : > { %1877 = vmatpush.bf16.msra.mxu2 %v1775_v7  ;;  %1878 = vmatpush.bf16.msra.mxu3 %v1775_v7 }
 0x1a0   : > { %904 = vmatpush.bf16.msra.mxu0 %v1774_v8  ;;  %1879 = vmatpush.bf16.msra.mxu1 %v1774_v8 }
 0x1a1   : > { %1880 = vmatpush.bf16.msra.mxu2 %v1774_v8  ;;  %1881 = vmatpush.bf16.msra.mxu3 %v1774_v8 }
 0x1a4   : > { %905 = vmatpush.bf16.msra.mxu0 %v1773_v9  ;;  %1882 = vmatpush.bf16.msra.mxu1 %v1773_v9 }
 0x1a5   : > { %1883 = vmatpush.bf16.msra.mxu2 %v1773_v9  ;;  %1884 = vmatpush.bf16.msra.mxu3 %v1773_v9 }
 0x1a7   : > { %906 = vmatmul.bf16.vlgmr.msra.gmra.mxu0 %v1765_v10  ;;  %916 = vmatmul.bf16.vlgmr.msra.gmra.mxu1 %v1767_v11 }
 0x1a8   : > { %926 = vmatmul.bf16.vlgmr.msra.gmra.mxu2 %v1769_v12  ;;  %936 = vmatmul.bf16.vlgmr.msra.gmra.mxu3 %v1771_v13 }
 0x1b7   : > { %911 = vmatmul.bf16.gmra.mxu0 %v1766_v14  ;;  %921 = vmatmul.bf16.gmra.mxu1 %v1768_v15 }
 0x1b8   : > { %931 = vmatmul.bf16.gmra.mxu2 %v1770_v16  ;;  %941 = vmatmul.bf16.gmra.mxu3 %v1772_v17 }
 0x224   : > { %v907_v20 = vpop.f32.mrf.mxu0  ;;  %v917_v21 = vpop.f32.mrf.mxu1 }
 0x225   : > { %v947_v22 = vadd.f32 %v907_v20, %v750_v18  ;;  %v951_v23 = vadd.f32 %v917_v21, %v754_v19 }
 0x227   : > { %963 = vst [vmem:[#allocation3 + $0x30] sm:$0xff] %v947_v22 }
 0x228   : > { %967 = vst [vmem:[#allocation3 + $0x50] sm:$0xff] %v951_v23 }
 0x22b   : > { %v927_v28 = vpop.f32.mrf.mxu2  ;;  %v937_v29 = vpop.f32.mrf.mxu3 }
 0x22c   : > { %v955_v30 = vadd.f32 %v927_v28, %v758_v24  ;;  %v959_v31 = vadd.f32 %v937_v29, %v762_v25  ;;  %v909_v32 = vpop.f32.mrf.mxu0  ;;  %v919_v33 = vpop.f32.mrf.mxu1 }
 0x22d   : > { %v948_v34 = vadd.f32 %v909_v32, %v751_v26  ;;  %v952_v35 = vadd.f32 %v919_v33, %v755_v27 }
 0x22e   : > { %971 = vst [vmem:[#allocation3 + $0x40] sm:$0xff] %v955_v30 }
 0x22f   : > { %975 = vst [vmem:[#allocation3 + $0x60] sm:$0xff] %v959_v31 }
 0x230   : > { %964 = vst [vmem:[#allocation3] sm:$0xff] %v948_v34 }
 0x231   : > { %968 = vst [vmem:[#allocation3 + $0x68] sm:$0xff] %v952_v35 }
 0x233   : > { %v929_v40 = vpop.f32.mrf.mxu2  ;;  %v939_v41 = vpop.f32.mrf.mxu3 }
 0x234   : > { %v956_v42 = vadd.f32 %v929_v40, %v759_v36  ;;  %v960_v43 = vadd.f32 %v939_v41, %v763_v37  ;;  %v912_v44 = vpop.f32.mrf.mxu0  ;;  %v922_v45 = vpop.f32.mrf.mxu1 }
 0x235   : > { %v949_v46 = vadd.f32 %v912_v44, %v752_v38  ;;  %v953_v47 = vadd.f32 %v922_v45, %v756_v39 }
 0x236   : > { %972 = vst [vmem:[#allocation3 + $0x20] sm:$0xff] %v956_v42 }
 0x237   : > { %976 = vst [vmem:[#allocation3 + $0x70] sm:$0xff] %v960_v43 }
 0x238   : > { %965 = vst [vmem:[#allocation3 + $0x58] sm:$0xff] %v949_v46 }
 0x239   : > { %969 = vst [vmem:[#allocation3 + $0x8] sm:$0xff] %v953_v47 }
 0x23b   : > { %v932_v52 = vpop.f32.mrf.mxu2  ;;  %v942_v53 = vpop.f32.mrf.mxu3 }
 0x23c   : > { %v957_v54 = vadd.f32 %v932_v52, %v760_v48  ;;  %v961_v55 = vadd.f32 %v942_v53, %v764_v49  ;;  %v914_v56 = vpop.f32.mrf.mxu0  ;;  %v924_v57 = vpop.f32.mrf.mxu1 }
 0x23d   : > { %v950_v58 = vadd.f32 %v914_v56, %v753_v50  ;;  %v954_v59 = vadd.f32 %v924_v57, %v757_v51 }
 0x23e   : > { %973 = vst [vmem:[#allocation3 + $0x10] sm:$0xff] %v957_v54 }
 0x23f   : > { %977 = vst [vmem:[#allocation3 + $0x78] sm:$0xff] %v961_v55 }
 0x240   : > { %966 = vst [vmem:[#allocation3 + $0x18] sm:$0xff] %v950_v58 }
 0x241   : > { %970 = vst [vmem:[#allocation3 + $0x48] sm:$0xff] %v954_v59 }
 0x243   : > { %v934_v62 = vpop.f32.mrf.mxu2  ;;  %v944_v63 = vpop.f32.mrf.mxu3 }
 0x244   : > { %v958_v0 = vadd.f32 %v934_v62, %v761_v60  ;;  %v962_v1 = vadd.f32 %v944_v63, %v765_v61 }
 0x246   : > { %974 = vst [vmem:[#allocation3 + $0x38] sm:$0xff] %v958_v0 }
 0x247   : > { %978 = vst [vmem:[#allocation3 + $0x28] sm:$0xff] %v962_v1 }
 0x248 PF: > { %s3133_s0 = sld [smem:[#allocation25_spill]] }
 0x24e   : > { %p979_p5 = scmp.eq.s32.totalorder %s3133_s0, 2 }
 0x250   : > { %p980_p11 = pnand %p979_p5, %p508_p9 }
 0x251   : > { %s3135_s22 = sld [smem:[#allocation41_spill]] (!%p980_p11) }
 0x252   : > { %983 = sbr.rel (%p980_p11) target bundleno = 792 (0x318), region = 88 }
 0x257   : > { %v1788_v2 = vld [vmem:[#allocation9 + $0x38] sm:$0xff]  ;;  %v1787_v3 = vld [vmem:[#allocation9 + $0x30] sm:$0xff]  ;;  %v985_v5 = vld [vmem:[#allocation3] sm:$0xff] }
 0x258   : > { %1141 = vmatpush.bf16.msra.mxu0 %v1788_v2  ;;  %1885 = vmatpush.bf16.msra.mxu1 %v1788_v2  ;;  %v984_v4 = vld [vmem:[#allocation3 + $0x30] sm:$0xff]  ;;  %v2851_v6 = vld [vmem:[%s3135_s22] ss:$0 sm:$0xff]  ;;  %v1786_v8 = vld [vmem:[#allocation9 + $0x28] sm:$0xff] }
 0x259   : > { %1886 = vmatpush.bf16.msra.mxu2 %v1788_v2  ;;  %1887 = vmatpush.bf16.msra.mxu3 %v1788_v2  ;;  %v988_v7 = vld [vmem:[#allocation3 + $0x50] sm:$0xff]  ;;  %v1004_v9 = vadd.f32 %v2851_v6, %v984_v4  ;;  %v1005_v10 = vadd.f32 %v2851_v6, %v985_v5  ;;  %v989_v11 = vld [vmem:[#allocation3 + $0x68] sm:$0xff]  ;;  %v1036_v13 = vld [vmem:[%s2786_s4] sm:$0xff] }
 0x25a   : > { %v1008_v12 = vadd.f32 %v2851_v6, %v988_v7  ;;  %v1009_v14 = vadd.f32 %v2851_v6, %v989_v11  ;;  %v992_v15 = vld [vmem:[#allocation3 + $0x40] sm:$0xff]  ;;  %v1037_v19 = vld [vmem:[%s2786_s4 + $0x8] sm:$0xff]  ;;  %v997_v23 = vld [vmem:[#allocation3 + $0x70] sm:$0xff] }
 0x25b   : > { %v993_v16 = vld [vmem:[#allocation3 + $0x20] sm:$0xff]  ;;  %v1020_v17 = vmax.f32 %v1004_v9, 0.0  ;;  %v1021_v18 = vmax.f32 %v1005_v10, 0.0  ;;  %v1012_v21 = vadd.f32 %v2851_v6, %v992_v15  ;;  %v1017_v28 = vadd.f32 %v2851_v6, %v997_v23  ;;  %v986_v29 = vld [vmem:[#allocation3 + $0x58] sm:$0xff]  ;;  %v1041_v32 = vld [vmem:[%s2786_s4 + $0x28] sm:$0xff] }
 0x25c   : > { %1142 = vmatpush.bf16.msra.mxu0 %v1787_v3  ;;  %1888 = vmatpush.bf16.msra.mxu1 %v1787_v3  ;;  %v1024_v20 = vmax.f32 %v1008_v12, 0.0  ;;  %v996_v22 = vld [vmem:[#allocation3 + $0x60] sm:$0xff]  ;;  %v1025_v24 = vmax.f32 %v1009_v14, 0.0  ;;  %v1013_v26 = vadd.f32 %v2851_v6, %v993_v16  ;;  %v987_v37 = vld [vmem:[#allocation3 + $0x18] sm:$0xff]  ;;  %v990_v38 = vld [vmem:[#allocation3 + $0x8] sm:$0xff]  ;;  %v1006_v44 = vadd.f32 %v2851_v6, %v986_v29 }
 0x25d   : > { %1889 = vmatpush.bf16.msra.mxu2 %v1787_v3  ;;  %1890 = vmatpush.bf16.msra.mxu3 %v1787_v3  ;;  %v1040_v25 = vld [vmem:[%s2786_s4 + $0x20] sm:$0xff]  ;;  %v1016_v27 = vadd.f32 %v2851_v6, %v996_v22  ;;  %v2864_v31 = vadd.f32 %v1036_v13, %v1020_v17  ;;  %v1028_v33 = vmax.f32 %v1012_v21, 0.0  ;;  %v2868_v35 = vadd.f32 %v1037_v19, %v1021_v18  ;;  %v991_v39 = vld [vmem:[#allocation3 + $0x48] sm:$0xff]  ;;  %v994_v45 = vld [vmem:[#allocation3 + $0x10] sm:$0xff] }
 0x25e   : > { %v1785_v30 = vld [vmem:[#allocation9 + $0x20] sm:$0xff]  ;;  %v1029_v36 = vmax.f32 %v1013_v26, 0.0  ;;  %v2872_v40 = vadd.f32 %v1040_v25, %v1024_v20  ;;  %v1045_v41 = vld [vmem:[%s2786_s4 + $0x48] sm:$0xff]  ;;  %v1033_v43 = vmax.f32 %v1017_v28, 0.0  ;;  %v2878_v46 = vadd.f32 %v1041_v32, %v1025_v24  ;;  %v995_v54 = vld [vmem:[#allocation3 + $0x38] sm:$0xff] }
 0x25f   : > { %v1044_v34 = vld [vmem:[%s2786_s4 + $0x40] sm:$0xff]  ;;  %1226 = vst [vmem:[%s2796_s26] sm:$0xff] %v2864_v31  ;;  %v1032_v42 = vmax.f32 %v1016_v27, 0.0  ;;  %v1049_v49 = vld [vmem:[%s2786_s4 + $0x68] sm:$0xff]  ;;  %v1007_v50 = vadd.f32 %v2851_v6, %v987_v37  ;;  %v1022_v51 = vmax.f32 %v1006_v44, 0.0  ;;  %v1010_v52 = vadd.f32 %v2851_v6, %v990_v38  ;;  %v998_v55 = vld [vmem:[#allocation3 + $0x78] sm:$0xff] }
 0x260   : > { %1143 = vmatpush.bf16.msra.mxu0 %v1786_v8  ;;  %1891 = vmatpush.bf16.msra.mxu1 %v1786_v8  ;;  %1227 = vst [vmem:[%s2796_s26 + $0x8] sm:$0xff] %v2868_v35  ;;  %v2880_v47 = vadd.f32 %v1044_v34, %v1028_v33  ;;  %v1048_v48 = vld [vmem:[%s2786_s4 + $0x60] sm:$0xff]  ;;  %v1011_v53 = vadd.f32 %v2851_v6, %v991_v39  ;;  %v999_v56 = vld [vmem:[#allocation3 + $0x28] sm:$0xff]  ;;  %v1784_v57 = vld [vmem:[#allocation9 + $0x18] sm:$0xff] }
 0x261   : > { %1892 = vmatpush.bf16.msra.mxu2 %v1786_v8  ;;  %1893 = vmatpush.bf16.msra.mxu3 %v1786_v8  ;;  %1230 = vst [vmem:[%s2796_s26 + $0x20] sm:$0xff] %v2872_v40  ;;  %v2891_v58 = vadd.f32 %v1045_v41, %v1029_v36  ;;  %v1038_v59 = vld [vmem:[%s2786_s4 + $0x10] sm:$0xff]  ;;  %v1014_v60 = vadd.f32 %v2851_v6, %v994_v45  ;;  %v1023_v63 = vmax.f32 %v1007_v50, 0.0  ;;  %v1039_v0 = vld [vmem:[%s2786_s4 + $0x18] sm:$0xff]  ;;  %v1026_v1 = vmax.f32 %v1010_v52, 0.0  ;;  %v1782_v22 = vld [vmem:[#allocation9 + $0x8] sm:$0xff] }
 0x262   : > { %1231 = vst [vmem:[%s2796_s26 + $0x28] sm:$0xff] %v2878_v46  ;;  %v2897_v61 = vadd.f32 %v1048_v48, %v1032_v42  ;;  %v2899_v62 = vadd.f32 %v1049_v49, %v1033_v43  ;;  %v1027_v2 = vmax.f32 %v1011_v53, 0.0  ;;  %v1042_v3 = vld [vmem:[%s2786_s4 + $0x30] sm:$0xff]  ;;  %v1015_v4 = vadd.f32 %v2851_v6, %v995_v54  ;;  %v1043_v9 = vld [vmem:[%s2786_s4 + $0x38] sm:$0xff]  ;;  %v1781_v26 = vld [vmem:[#allocation9] sm:$0xff] }
 0x263   : > { %1234 = vst [vmem:[%s2796_s26 + $0x40] sm:$0xff] %v2880_v47  ;;  %v1018_v5 = vadd.f32 %v2851_v6, %v998_v55  ;;  %v1019_v7 = vadd.f32 %v2851_v6, %v999_v56  ;;  %v1054_v8 = vadd.f32 %v1038_v59, %v1022_v51  ;;  %v1030_v10 = vmax.f32 %v1014_v60, 0.0  ;;  %v1783_v11 = vld [vmem:[#allocation9 + $0x10] sm:$0xff]  ;;  %v1047_v15 = vld [vmem:[%s2786_s4 + $0x58] sm:$0xff] }
 0x264   : > { %1144 = vmatpush.bf16.msra.mxu0 %v1785_v30  ;;  %1894 = vmatpush.bf16.msra.mxu1 %v1785_v30  ;;  %1235 = vst [vmem:[%s2796_s26 + $0x48] sm:$0xff] %v2891_v58  ;;  %v1055_v12 = vadd.f32 %v1039_v0, %v1023_v63  ;;  %v1031_v13 = vmax.f32 %v1015_v4, 0.0  ;;  %v1046_v14 = vld [vmem:[%s2786_s4 + $0x50] sm:$0xff]  ;;  %v1058_v6 = vadd.f32 %v1042_v3, %v1026_v1  ;;  %v1051_v21 = vld [vmem:[%s2786_s4 + $0x78] sm:$0xff] }
 0x265   : > { %1895 = vmatpush.bf16.msra.mxu2 %v1785_v30  ;;  %1896 = vmatpush.bf16.msra.mxu3 %v1785_v30  ;;  %1238 = vst [vmem:[%s2796_s26 + $0x60] sm:$0xff] %v2897_v61  ;;  %v1034_v16 = vmax.f32 %v1018_v5, 0.0  ;;  %v1059_v17 = vadd.f32 %v1043_v9, %v1027_v2  ;;  %v1035_v18 = vmax.f32 %v1019_v7, 0.0  ;;  %v1050_v19 = vld [vmem:[%s2786_s4 + $0x70] sm:$0xff]  ;;  %v1062_v20 = vadd.f32 %v1046_v14, %v1030_v10  ;;  %s3136_s4 = sld [smem:[#allocation26_spill]] }
 0x266   : > { %1239 = vst [vmem:[%s2796_s26 + $0x68] sm:$0xff] %v2899_v62  ;;  %v1063_v23 = vadd.f32 %v1047_v15, %v1031_v13  ;;  %v1069_v27 = vpack.c.bf16 %v2868_v35, %v2864_v31  ;;  %v1071_v28 = vpack.c.bf16 %v2878_v46, %v2872_v40  ;;  %v1073_v29 = vpack.c.bf16 %v2891_v58, %v2880_v47 }
 0x267   : > { %1228 = vst [vmem:[%s2796_s26 + $0x10] sm:$0xff] %v1054_v8  ;;  %v1066_v24 = vadd.f32 %v1050_v19, %v1034_v16  ;;  %v1067_v25 = vadd.f32 %v1051_v21, %v1035_v18  ;;  %v1075_v30 = vpack.c.bf16 %v2899_v62, %v2897_v61  ;;  %v1070_v32 = vpack.c.bf16 %v1055_v12, %v1054_v8 }
 0x268   : > { %1145 = vmatpush.bf16.msra.mxu0 %v1784_v57  ;;  %1897 = vmatpush.bf16.msra.mxu1 %v1784_v57  ;;  %1229 = vst [vmem:[%s2796_s26 + $0x18] sm:$0xff] %v1055_v12  ;;  %v1072_v31 = vpack.c.bf16 %v1059_v17, %v1058_v6  ;;  %v1074_v33 = vpack.c.bf16 %v1063_v23, %v1062_v20 }
 0x269   : > { %1898 = vmatpush.bf16.msra.mxu2 %v1784_v57  ;;  %1899 = vmatpush.bf16.msra.mxu3 %v1784_v57  ;;  %1232 = vst [vmem:[%s2796_s26 + $0x30] sm:$0xff] %v1058_v6  ;;  %v1076_v34 = vpack.c.bf16 %v1067_v25, %v1066_v24 }
 0x26a   : > { %1233 = vst [vmem:[%s2796_s26 + $0x38] sm:$0xff] %v1059_v17 }
 0x26b   : > { %1236 = vst [vmem:[%s2796_s26 + $0x50] sm:$0xff] %v1062_v20  ;;  %s1706_s19 = sshll.u32 %s3136_s4, 7 }
 0x26c   : > { %1146 = vmatpush.bf16.msra.mxu0 %v1783_v11  ;;  %1900 = vmatpush.bf16.msra.mxu1 %v1783_v11  ;;  %1237 = vst [vmem:[%s2796_s26 + $0x58] sm:$0xff] %v1063_v23  ;;  %s1206_s15 = sshra.s32 %s1706_s19, 3 }
 0x26d   : > { %1901 = vmatpush.bf16.msra.mxu2 %v1783_v11  ;;  %1902 = vmatpush.bf16.msra.mxu3 %v1783_v11  ;;  %1240 = vst [vmem:[%s2796_s26 + $0x70] sm:$0xff] %v1066_v24  ;;  %s1739_s23 = sshll.u32 %s1206_s15, 2 }
 0x26e   : > { %1241 = vst [vmem:[%s2796_s26 + $0x78] sm:$0xff] %v1067_v25  ;;  %s1209_s5 = scalar_lea.vmem [#allocation2], %s1739_s23 }
 0x270   : > { %1147 = vmatpush.bf16.msra.mxu0 %v1782_v22  ;;  %1903 = vmatpush.bf16.msra.mxu1 %v1782_v22 }
 0x271   : > { %1904 = vmatpush.bf16.msra.mxu2 %v1782_v22  ;;  %1905 = vmatpush.bf16.msra.mxu3 %v1782_v22 }
 0x274   : > { %1148 = vmatpush.bf16.msra.mxu0 %v1781_v26  ;;  %1906 = vmatpush.bf16.msra.mxu1 %v1781_v26 }
 0x275   : > { %1907 = vmatpush.bf16.msra.mxu2 %v1781_v26  ;;  %1908 = vmatpush.bf16.msra.mxu3 %v1781_v26 }
 0x277   : > { %1149 = vmatmul.bf16.vlgmr.msra.gmra.mxu0 %v1069_v27  ;;  %1159 = vmatmul.bf16.vlgmr.msra.gmra.mxu1 %v1071_v28 }
 0x278   : > { %1169 = vmatmul.bf16.vlgmr.msra.gmra.mxu2 %v1073_v29  ;;  %1179 = vmatmul.bf16.vlgmr.msra.gmra.mxu3 %v1075_v30 }
 0x287   : > { %1154 = vmatmul.bf16.gmra.mxu0 %v1070_v32  ;;  %1164 = vmatmul.bf16.gmra.mxu1 %v1072_v31 }
 0x288   : > { %1174 = vmatmul.bf16.gmra.mxu2 %v1074_v33  ;;  %1184 = vmatmul.bf16.gmra.mxu3 %v1076_v34 }
 0x2f4   : > { %v1150_v35 = vpop.f32.mrf.mxu0  ;;  %v1160_v36 = vpop.f32.mrf.mxu1 }
 0x2fb   : > { %v1170_v37 = vpop.f32.mrf.mxu2  ;;  %v1180_v38 = vpop.f32.mrf.mxu3 }
 0x2fc   : > { %v1152_v39 = vpop.f32.mrf.mxu0  ;;  %v1162_v40 = vpop.f32.mrf.mxu1 }
 0x2fd   : > { %v1793_v41 = vpack.c.bf16 %v1152_v39, %v1150_v35  ;;  %v1803_v42 = vpack.c.bf16 %v1162_v40, %v1160_v36 }
 0x2ff   : > { %1794 = vst [vmem:[%s1209_s5] sm:$0xff] %v1793_v41  }
 0x300   : > { %1831 = vst [vmem:[%s1209_s5 + $0x10] sm:$0xff] %v1803_v42  }
 0x303   : > { %v1172_v43 = vpop.f32.mrf.mxu2  ;;  %v1182_v44 = vpop.f32.mrf.mxu3 }
 0x304   : > { %v1813_v45 = vpack.c.bf16 %v1172_v43, %v1170_v37  ;;  %v1823_v46 = vpack.c.bf16 %v1182_v44, %v1180_v38  ;;  %v1155_v47 = vpop.f32.mrf.mxu0  ;;  %v1165_v48 = vpop.f32.mrf.mxu1 }
 0x306   : > { %1833 = vst [vmem:[%s1209_s5 + $0x20] sm:$0xff] %v1813_v45  }
 0x307   : > { %1835 = vst [vmem:[%s1209_s5 + $0x30] sm:$0xff] %v1823_v46  }
 0x30b   : > { %v1175_v49 = vpop.f32.mrf.mxu2  ;;  %v1185_v50 = vpop.f32.mrf.mxu3 }
 0x30c   : > { %v1157_v51 = vpop.f32.mrf.mxu0  ;;  %v1167_v52 = vpop.f32.mrf.mxu1 }
 0x30d   : > { %v1798_v53 = vpack.c.bf16 %v1157_v51, %v1155_v47  ;;  %v1808_v54 = vpack.c.bf16 %v1167_v52, %v1165_v48 }
 0x30f   : > { %1830 = vst [vmem:[%s1209_s5 + $0x8] sm:$0xff] %v1798_v53  }
 0x310   : > { %1832 = vst [vmem:[%s1209_s5 + $0x18] sm:$0xff] %v1808_v54  }
 0x313   : > { %v1177_v55 = vpop.f32.mrf.mxu2  ;;  %v1187_v56 = vpop.f32.mrf.mxu3 }
 0x314   : > { %v1818_v57 = vpack.c.bf16 %v1177_v55, %v1175_v49  ;;  %v1828_v58 = vpack.c.bf16 %v1187_v56, %v1185_v50 }
 0x316   : > { %1834 = vst [vmem:[%s1209_s5 + $0x28] sm:$0xff] %v1818_v57  }
 0x317   : > { %1836 = vst [vmem:[%s1209_s5 + $0x38] sm:$0xff] %v1828_v58  }
 0x318 PF: > { %p1242_p3 = pnand %p979_p5, %p745_p7 }
 0x319   : > { %s3139_s2 = sld [smem:[#allocation42_spill]] (!%p1242_p3) }
 0x31a   : > { %1245 = sbr.rel (%p1242_p3) target bundleno = 964 (0x3c4), region = 92 }
 0x31f   : > { %v1261_v59 = vld [vmem:[#allocation3 + $0x28] sm:$0xff]  ;;  %v2095_v60 = vld [vmem:[%s3139_s2] ss:$0 sm:$0xff]  ;;  %v1260_v61 = vld [vmem:[#allocation3 + $0x78] sm:$0xff] }
 0x320   : > { %v1259_v62 = vld [vmem:[#allocation3 + $0x70] sm:$0xff]  ;;  %v1258_v63 = vld [vmem:[#allocation3 + $0x60] sm:$0xff]  ;;  %v1281_v0 = vadd.f32 %v2095_v60, %v1261_v59  ;;  %v1280_v1 = vadd.f32 %v2095_v60, %v1260_v61  ;;  %v1257_v3 = vld [vmem:[#allocation3 + $0x38] sm:$0xff] }
 0x321   : > { %v1279_v2 = vadd.f32 %v2095_v60, %v1259_v62  ;;  %v1256_v4 = vld [vmem:[#allocation3 + $0x10] sm:$0xff]  ;;  %v1278_v5 = vadd.f32 %v2095_v60, %v1258_v63  ;;  %v1255_v7 = vld [vmem:[#allocation3 + $0x20] sm:$0xff]  ;;  %v1277_v10 = vadd.f32 %v2095_v60, %v1257_v3  ;;  %v1253_v13 = vld [vmem:[#allocation3 + $0x48] sm:$0xff] }
 0x322   : > { %v1297_v8 = vmax.f32 %v1281_v0, 0.0  ;;  %v1296_v9 = vmax.f32 %v1280_v1, 0.0  ;;  %v1254_v11 = vld [vmem:[#allocation3 + $0x40] sm:$0xff]  ;;  %v1276_v12 = vadd.f32 %v2095_v60, %v1256_v4  ;;  %v1275_v6 = vadd.f32 %v2095_v60, %v1255_v7  ;;  %v1252_v15 = vld [vmem:[#allocation3 + $0x8] sm:$0xff]  ;;  %v1250_v21 = vld [vmem:[#allocation3 + $0x50] sm:$0xff] }
 0x323   : > { %v1295_v14 = vmax.f32 %v1279_v2, 0.0  ;;  %v1294_v16 = vmax.f32 %v1278_v5, 0.0  ;;  %v1274_v17 = vadd.f32 %v2095_v60, %v1254_v11  ;;  %v1251_v18 = vld [vmem:[#allocation3 + $0x68] sm:$0xff]  ;;  %v1293_v19 = vmax.f32 %v1277_v10, 0.0  ;;  %v1249_v24 = vld [vmem:[#allocation3 + $0x18] sm:$0xff]  ;;  %v1247_v30 = vld [vmem:[#allocation3] sm:$0xff] }
 0x324   : > { %1313 = vst [vmem:[%s2796_s26 + $0x78] sm:$0xff] %v1297_v8  ;;  %1316 = vmatpush.msra.mxu0 %v1297_v8  ;;  %v1273_v20 = vadd.f32 %v2095_v60, %v1253_v13  ;;  %v1292_v22 = vmax.f32 %v1276_v12, 0.0  ;;  %v1272_v23 = vadd.f32 %v2095_v60, %v1252_v15  ;;  %v1291_v25 = vmax.f32 %v1275_v6, 0.0  ;;  %v1248_v27 = vld [vmem:[#allocation3 + $0x58] sm:$0xff]  ;;  %v1246_v33 = vld [vmem:[#allocation3 + $0x30] sm:$0xff]  ;;  %v1315_v44 = vld [vmem:[%s2794_s13] sm:$0xff] }
 0x325   : > { %1312 = vst [vmem:[%s2796_s26 + $0x70] sm:$0xff] %v1296_v9  ;;  %v1271_v26 = vadd.f32 %v2095_v60, %v1251_v18  ;;  %v1290_v28 = vmax.f32 %v1274_v17, 0.0  ;;  %v1270_v29 = vadd.f32 %v2095_v60, %v1250_v21  ;;  %v1269_v31 = vadd.f32 %v2095_v60, %v1249_v24  ;;  %v1314_v45 = vld [vmem:[#allocation14] sm:$0xff] }
 0x326   : > { %1317 = vmatpush.msra.mxu0 %v1296_v9  ;;  %1311 = vst [vmem:[%s2796_s26 + $0x68] sm:$0xff] %v1295_v14  ;;  %v1289_v32 = vmax.f32 %v1273_v20, 0.0  ;;  %v1288_v34 = vmax.f32 %v1272_v23, 0.0  ;;  %v1268_v35 = vadd.f32 %v2095_v60, %v1248_v27  ;;  %v1267_v37 = vadd.f32 %v2095_v60, %v1247_v30 }
 0x327   : > { %1310 = vst [vmem:[%s2796_s26 + $0x60] sm:$0xff] %v1294_v16  ;;  %v1287_v36 = vmax.f32 %v1271_v26, 0.0  ;;  %v1286_v38 = vmax.f32 %v1270_v29, 0.0  ;;  %v1266_v39 = vadd.f32 %v2095_v60, %v1246_v33  ;;  %v1285_v40 = vmax.f32 %v1269_v31, 0.0 }
 0x328   : > { %1318 = vmatpush.msra.mxu0 %v1295_v14  ;;  %1309 = vst [vmem:[%s2796_s26 + $0x58] sm:$0xff] %v1293_v19  ;;  %v1284_v41 = vmax.f32 %v1268_v35, 0.0  ;;  %v1283_v42 = vmax.f32 %v1267_v37, 0.0 }
 0x329   : > { %1308 = vst [vmem:[%s2796_s26 + $0x50] sm:$0xff] %v1292_v22  ;;  %v1282_v43 = vmax.f32 %v1266_v39, 0.0 }
 0x32a   : > { %1319 = vmatpush.msra.mxu0 %v1294_v16  ;;  %1307 = vst [vmem:[%s2796_s26 + $0x48] sm:$0xff] %v1291_v25 }
 0x32b   : > { %1306 = vst [vmem:[%s2796_s26 + $0x40] sm:$0xff] %v1290_v28 }
 0x32c   : > { %1320 = vmatpush.msra.mxu0 %v1293_v19  ;;  %1305 = vst [vmem:[%s2796_s26 + $0x38] sm:$0xff] %v1289_v32 }
 0x32d   : > { %1304 = vst [vmem:[%s2796_s26 + $0x30] sm:$0xff] %v1288_v34 }
 0x32e   : > { %1321 = vmatpush.msra.mxu0 %v1292_v22  ;;  %1303 = vst [vmem:[%s2796_s26 + $0x28] sm:$0xff] %v1287_v36 }
 0x32f   : > { %1302 = vst [vmem:[%s2796_s26 + $0x20] sm:$0xff] %v1286_v38 }
 0x330   : > { %1322 = vmatpush.msra.mxu0 %v1291_v25  ;;  %1301 = vst [vmem:[%s2796_s26 + $0x18] sm:$0xff] %v1285_v40 }
 0x331   : > { %1300 = vst [vmem:[%s2796_s26 + $0x10] sm:$0xff] %v1284_v41 }
 0x332   : > { %1323 = vmatpush.msra.mxu0 %v1290_v28  ;;  %1299 = vst [vmem:[%s2796_s26 + $0x8] sm:$0xff] %v1283_v42 }
 0x333   : > { %1298 = vst [vmem:[%s2796_s26] sm:$0xff] %v1282_v43 }
 0x334   : > { %1324 = vmatpush.msra.mxu0 %v1289_v32 }
 0x336   : > { %1325 = vmatpush.msra.mxu0 %v1288_v34 }
 0x338   : > { %1326 = vmatpush.msra.mxu0 %v1287_v36 }
 0x33a   : > { %1327 = vmatpush.msra.mxu0 %v1286_v38 }
 0x33c   : > { %1328 = vmatpush.msra.mxu0 %v1285_v40 }
 0x33e   : > { %1329 = vmatpush.msra.mxu0 %v1284_v41 }
 0x340   : > { %1330 = vmatpush.msra.mxu0 %v1283_v42 }
 0x342   : > { %1331 = vmatpush.msra.mxu0 %v1282_v43 }
 0x343   : > { %1332 = vmatmul.f32.vlgmr.msra.gmra.mxu0 %v1315_v44 }
 0x3c0   : > { %v1333_v46 = vpop.f32.mrf.mxu0 }
 0x3c1   : > { %v1336_v47 = vadd.f32 %v1333_v46, %v1314_v45 }
 0x3c3   : > { %1337 = vst [vmem:[#allocation14] sm:$0xff] %v1336_v47 }
 0x3c4 PF: > { %s3140_s3 = sld [smem:[#allocation26_spill]]  ;;  %s1351_s22 = sshll.u32 %s2796_s26, 4  ;;  %s1352_s22 = int_to_ptr.vmem [resolvable:$true] %s1351_s22 }
 0x3c5   : > { %s3142_s24 = sld [smem:[#allocation44_spill]]  ;;  %s1339_s13 = scalar_lea.sflag [#allocation6], %s2783_s30 }
 0x3ca   : > { %s1789_s11 = sshll.u32 %s3140_s3, 7 }
 0x3cb   : > { %s1350_s27 = scalar_lea.hbm %s3142_s24, %s1789_s11  ;;  %s2266_s16 = scalar_lea.hbm %s3142_s24, 384 }
 0x3cc   : > { %s1353_s4 = sshll.u32 %s1350_s27, 4  ;;  %s1354_s4 = int_to_ptr.hbm [resolvable:$true] %s1353_s4 }
 0x3cd   : > { %s2260_s19 = sshra.s32 %s1354_s4, 4  ;;  %s2261_s19 = int_to_ptr.hbm [resolvable:$true] %s2260_s19 }
 0x3ce   : > { %s2262_s15 = scalar_lea.hbm %s2261_s19, 128  ;;  %p2267_p4 = scmp.lt.s32.totalorder %s2261_s19, %s3142_s24 }
 0x3cf   : > { %p2263_p1 = scmp.ne.s32.totalorder %s2261_s19, %s2262_s15  ;;  %p2268_p6 = scmp.lt.s32.totalorder %s2266_s16, %s2262_s15 }
 0x3d1   : > { %p2264_p9 = pnand %p2263_p1, %p2633_p13  ;;  %p2269_p2 = por %p2268_p6, %p2267_p4 }
 0x3d3   : > { %p2265_p12 = pneg %p2264_p9 }
 0x3d5   : > { %p2270_p10 = pnand %p2269_p2, %p2265_p12 }
 0x3d7   : > { %2273 = shalt.err (!%p2270_p10)
}
 0x3d8   : > { %s2462_s30 = smov 128   ;;  %s2463_s26 = smov 8  }
 0x3d9   : > { %1922 = dma.vmem_to_hbm [thread:$0]  (%p2633_p13), %s1352_s22, 2048, %s1354_s4, %s1339_s13, %s2462_s30, %s2462_s30, %s2463_s26  }
 0x3da   : > { %s3143_s3 = sld [smem:[#allocation45_spill]]  ;;  %s2464_s0 = smov [#allocation14]  }
 0x3db   : > { %s1366_s1 = sshll.u32 %s2464_s0, 4  ;;  %p3144_p7 = scmp.eq.s32.totalorder %s2591_s21, 17  ;;  %s1367_s1 = int_to_ptr.vmem [resolvable:$true] %s1366_s1 }
 0x3dd   : > { %p3145_p8 = pmov %p3144_p7 }
 0x3e0   : > { %s1368_s11 = sshll.u32 %s3143_s3, 4  ;;  %s1369_s11 = int_to_ptr.hbm [resolvable:$true] %s1368_s11 }
 0x3e1   : > { %1924 = dma.vmem_to_hbm [thread:$0]  (%p3144_p7), %s1367_s1, 128, %s1369_s11, [#allocation15]  }
 0x3e2   : > { %2383 = dma.done.wait (%p3145_p8), [#allocation15], 128   ;;  %p3146_p5 = pmov %p3144_p7 }
 0x3e4   : > { %2385 = vsyncadd (%p3146_p5), [#allocation15], 4294967168 }
 0x3e5 PF: > { %s3147_s27 = sld [smem:[#allocation22_spill]]  ;;  %p1954_p13 = scmp.ge.s32.totalorder %s2452_s20, 2 }
 0x3e7   : > { %p1946_p11 = pnand %p1954_p13, %p2637_p0 }
 0x3e9   : > { %p1947_p3 = pneg %p1946_p11 }
 0x3eb   : > { %s1385_s22 = sand.u32 1, %s3147_s27  }
 0x3ec   : > { %s1386_s4 = scalar_lea.sflag [#allocation6], %s1385_s22 }
 0x3ed   : > { %2387 = dma.done.wait (%p1947_p3), %s1386_s4, 2048  }
 0x3ee   : > { %2389 = vsyncadd (%p1947_p3), %s1386_s4, 4294965248  ;;  %s32_s20 = sadd.s32 1, %s2452_s20   ;;  %s3150_s27 = sld [smem:[#allocation23_spill]] }
 0x3ef   : > { %p2988_p1 = scmp.ge.s32.totalorder %s32_s20, 20   ;;  %s3151_s21 = sld [smem:[#allocation37_spill]] }
 0x3f0   : > { %s3152_s19 = sld [smem:[#allocation24_spill]]  ;;  %s3159_s28 = smov %s2400_s29 }
 0x3f1   : > { %s3153_s15 = sld [smem:[#allocation36_spill]]  ;;  %s3161_s30 = smov %s2408_s9 }
 0x3f2   : > { %s3154_s16 = sld [smem:[#allocation28_spill]]  ;;  %s3162_s9 = smov %s2412_s10 }
 0x3f3   : > { %s3155_s23 = sld [smem:[#allocation32_spill]]  ;;  %s3163_s10 = smov %s2726_s8 }
 0x3f4   : > { %s3156_s5 = sld [smem:[#allocation34_spill]]  ;;  %s3164_s11 = smov %s2420_s12 }
 0x3f5   : > { %s3157_s7 = sld [smem:[#allocation35_spill]]  ;;  %s3160_s29 = smov %s3151_s21 }
 0x3f6   : > { %s3165_s12 = smov %s3152_s19  ;;  %s3167_s14 = smov %s2440_s17 }
 0x3f7   : > { %s3166_s13 = smov %s3153_s15  ;;  %s3168_s15 = smov %s2444_s18 }
 0x3f8   :  { %31 = sbr.rel (!%p2988_p1) target bundleno = 25 (0x19), region = 168 }
 0x3f9   : > { %s3169_s17 = smov %s3155_s23 }
 0x3fa   : > { %s3170_s18 = smov %s3156_s5 }
 0x3fb   : > { %s3171_s19 = smov %s3157_s7 }
 0x3fd   :  { %1392 = vsyncpa [#allocation5], 1 }
 0x3fe   :  { %1394 = vsyncpa [#allocation5 + $0x1], 1 }
 0x3ff   :  { %1395 = vsyncpa [#allocation8], 1 }
 0x400   :  { %1397 = vsyncpa [#allocation8 + $0x1], 1 }
 0x401   :  { %1398 = vsyncpa [#allocation11], 1 }
 0x402   :  { %1400 = vsyncpa [#allocation11 + $0x1], 1 }
 0x403   :  { %1401 = vsyncpa [#allocation6], 1 }
 0x404   :  { %1403 = vsyncpa [#allocation6 + $0x1], 1 }
 0x405   :  { %1404 = vsyncpa [#allocation15], 1 }

</bundles_post_ra>
